<compile_context>
chip_gen: v7x
topology: tpu7x:2x2x1
jax: 0.10.0
libtpu: 0.0.40
codegen_flags: <defaults>
</compile_context>

<pallas_src>
import functools
import math

import jax
import jax.numpy as jnp
import numpy as np
from jax.experimental import pallas as pl
from jax.experimental.pallas import tpu as pltpu


def _ceil_to(a: int, m: int) -> int:
    return ((a + m - 1) // m) * m


def _choose_tile_h(Wout: int, KWin: int, itemsize: int) -> int:
    """Rows per grid step: smallest group making the output slab lane-dense (x128),
    bumped to >= 8 to amortize per-step overhead, capped so the double-buffered weight
    group stays comfortably small."""
    base = 128 // math.gcd(Wout, 128)      # TILE_H*Wout % 128 == 0 for any multiple of base
    tile = max(base, 8)
    while tile > base and 2 * tile * KWin * Wout * itemsize > (4 << 20):
        tile //= 2
    return tile


def _sparse_linear_kernel(mask_ref, x_ref, w_ref, b_ref, o_ref, *, tile_h, K, Win):
    """One group of tile_h output rows per grid step.  Grid = (Hout_p // tile_h,).

    Refs per step:
      mask_ref: (Hout_p*K,) int32 in SMEM (scalar prefetch, flat)
      x_ref:    (Hin, Bp, Win)          whole x, resident (constant index_map)
      w_ref:    (tile_h, K*Win, Wout)   this group's prepacked weights (already W_i.T)
      b_ref:    (1, 1, tile_h*Wout)     this group's biases, flattened lane-major (f32)
      o_ref:    (Bp, tile_h*Wout)       lane-dense output slab
    """
    g = pl.program_id(0)
    chunks = []
    for r in range(tile_h):                          # static -> fully unrolled
        row = g * tile_h + r
        acc = None
        for k in range(K):                           # static -> fully unrolled
            # Gather one input row from the resident x buffer and accumulate its dot:
            # no VMEM gather scratch, no store->load dependency before the matmul.
            lhs = x_ref[mask_ref[row * K + k]]                      # (Bp, Win)
            rhs = w_ref[r, k * Win:(k + 1) * Win, :]                # (Win, Wout)
            part = jnp.dot(lhs, rhs, preferred_element_type=jnp.float32)
            acc = part if acc is None else acc + part
        chunks.append(acc)                                          # (Bp, Wout) f32
    out = jnp.concatenate(chunks, axis=-1)                          # (Bp, tile_h*Wout) f32
    # f32 epilogue (bias add) on the f32 accumulator; single unmasked lane-dense store.
    o_ref[...] = (out + b_ref[0]).astype(o_ref.dtype)


def prepack_params(weights, biases, *, compute_dtype=jnp.float32, tile_h=None):
    """One-time (parameter-init-time) repack; NOT part of the per-call hot path.

    weights: (Hout, Wout, K*Win) F.linear layout -> (Hout_p, K*Win, Wout) (= W_i.T slabs,
             zero-padded to a multiple of tile_h rows, cast to compute_dtype)
    biases:  (Hout, Wout) -> (Hout_p//tile_h, 1, tile_h*Wout) float32
    """
    Hout, Wout, KWin = weights.shape
    if tile_h is None:
        tile_h = _choose_tile_h(Wout, KWin, jnp.dtype(compute_dtype).itemsize)
    Hout_p = _ceil_to(Hout, tile_h)
    w = jnp.transpose(weights, (0, 2, 1)).astype(compute_dtype)     # (Hout, KWin, Wout)
    b = biases.astype(jnp.float32)                                  # bias/epilogue stay f32
    if Hout_p != Hout:
        w = jnp.pad(w, ((0, Hout_p - Hout), (0, 0), (0, 0)))
        b = jnp.pad(b, ((0, Hout_p - Hout), (0, 0)))
    b = b.reshape(Hout_p // tile_h, 1, tile_h * Wout)
    return w, b, tile_h


def auto_sparse_linear(x, w_packed, b_packed, kernel_mask, *, tile_h,
                       out_dtype=jnp.float32):
    """
    x:           (B, Hin, Win)
    w_packed:    (Hout_p, K*Win, Wout)      from prepack_params (init-time)
    b_packed:    (Hout_p//tile_h, 1, tile_h*Wout)
    kernel_mask: (Hout, K) int row indices into Hin (must satisfy 0 <= idx < Hin;
                 out-of-range indices read wrong VMEM silently -- validate host-side)
    returns:     (B, Hout, Wout)
    """
    B, Hin, Win = x.shape
    Hout_p, KWin, Wout = w_packed.shape
    Hout, K = kernel_mask.shape
    assert KWin == K * Win
    assert Hout_p % tile_h == 0 and Hout <= Hout_p
    n_groups = Hout_p // tile_h
    compute_dtype = w_packed.dtype

    # Pad batch to full sublanes (8 for f32, 16 for packed 16-bit dtypes).
    sub = 16 if jnp.dtype(compute_dtype).itemsize < 4 else 8
    Bp = _ceil_to(B, sub)

    # Gather axis leading for cheap dynamic first-axis indexing in-kernel.
    # TODO(synk): for large shapes, let producers hand over x already in (Hin, B, Win)
    # layout so this transpose (an extra HBM round trip) disappears.
    x_t = jnp.transpose(x, (1, 0, 2)).astype(compute_dtype)
    if Bp != B:
        x_t = jnp.pad(x_t, ((0, 0), (0, Bp - B), (0, 0)))

    # Flat 1-D mask for SMEM scalar prefetch (2-D SMEM pads columns to 128 words).
    mask = kernel_mask.astype(jnp.int32)
    if Hout_p != Hout:
        mask = jnp.pad(mask, ((0, Hout_p - Hout), (0, 0)))   # padded rows gather row 0
    mask_flat = mask.reshape(-1)                              # (Hout_p*K,)

    # NOTE: x is kept fully resident in VMEM (Hin*Bp*Win*itemsize bytes).
    # TODO(synk): if 2*x bytes + 2*weight-group bytes exceeds the scoped VMEM limit
    # (esp. v7x, 64 MiB physical), fall back to a data-dependent pl.Element gather on x
    # / batch tiling instead of the resident buffer, and single-buffer the invariant
    # x spec (pipeline_mode=pl.Buffered(1)).
    bytes_accessed = (x_t.size * x_t.dtype.itemsize
                      + w_packed.size * w_packed.dtype.itemsize
                      + b_packed.size * b_packed.dtype.itemsize
                      + Bp * Hout_p * Wout * jnp.dtype(out_dtype).itemsize)
    cost = pl.CostEstimate(flops=2 * Bp * Hout_p * KWin * Wout,
                           transcendentals=0,
                           bytes_accessed=int(bytes_accessed))

    kernel = functools.partial(_sparse_linear_kernel, tile_h=tile_h, K=K, Win=Win)

    out_flat = pl.pallas_call(
        kernel,
        out_shape=jax.ShapeDtypeStruct((Bp, Hout_p * Wout), out_dtype),
        grid_spec=pltpu.PrefetchScalarGridSpec(
            num_scalar_prefetch=1,
            grid=(n_groups,),
            in_specs=[
                # whole x, grid-invariant block -> DMA'd once, resident across all groups
                pl.BlockSpec((Hin, Bp, Win), lambda g, m: (0, 0, 0)),
                # per-group weight slab (the only real HBM stream)
                # TODO(synk): on v5e, if the weight stream is still exposed, deepen it with
                # pipeline_mode=pl.Buffered(3).
                pl.BlockSpec((tile_h, KWin, Wout), lambda g, m: (g, 0, 0)),
                pl.BlockSpec((1, 1, tile_h * Wout), lambda g, m: (g, 0, 0)),
            ],
            out_specs=pl.BlockSpec((Bp, tile_h * Wout), lambda g, m: (0, g)),
        ),
        compiler_params=pltpu.CompilerParams(
            dimension_semantics=("parallel",),      # independent row groups
            # 32 MiB scoped VMEM is safe on every generation (v7x physical = 64 MiB) and
            # covers resident x + double-buffered weight groups for these shapes.
            vmem_limit_bytes=32 * 1024 * 1024,
        ),
        cost_estimate=cost,
    )(mask_flat, x_t, w_packed, b_packed)

    # Epilogue is pure metadata: row-major reshape + slice off batch/row padding.
    return out_flat.reshape(Bp, Hout_p, Wout)[:B, :Hout, :]


def _reference_forward(x, weights, biases, kernel_mask):
    """Pure-JAX reference mirroring the PyTorch forward (original weight layout)."""
    B = x.shape[0]
    outs = []
    for i in range(kernel_mask.shape[0]):
        g = x[:, kernel_mask[i], :].reshape(B, -1)        # (B, K*Win)
        outs.append(g @ weights[i].T + biases[i])         # (B, Wout)
    return jnp.stack(outs, axis=1)                        # (B, Hout, Wout)


if __name__ == "__main__":
    # Small shapes consistent with the module:
    #   input_format  = (Hin, Win) = (8, 32)
    #   output_format = (Hout, Wout) = (20, 16)
    #   kernel_size K = 3, batch B = 4
    B, Hin, Win = 4, 8, 32
    Hout, Wout, K = 20, 16, 3

    # Deterministic kernel_mask (the module accepts a user-provided kernel_mask;
    # its internal _generate_mask is a randomized pair-covering graph construction).
    # TODO(synk): the randomized mask generator is host-side setup, not kernel work;
    # a deterministic valid mask is supplied instead.
    kernel_mask_np = np.array(
        [[(i + j) % Hin for j in range(K)] for i in range(Hout)], dtype=np.int32)
    assert kernel_mask_np.min() >= 0 and kernel_mask_np.max() < Hin  # no silent OOB reads
    kernel_mask = jnp.asarray(kernel_mask_np)

    # Deterministic parameter init matching kaiming_uniform_(a=sqrt(5)) / uniform bias:
    # both reduce to U(-1/sqrt(fan_in), 1/sqrt(fan_in)).
    fan_in = K * Win
    bound = 1.0 / math.sqrt(fan_in)
    key = jax.random.PRNGKey(0)
    kw, kb, kx = jax.random.split(key, 3)
    weights = jax.random.uniform(
        kw, (Hout, Wout, fan_in), minval=-bound, maxval=bound, dtype=jnp.float32)
    biases = jax.random.uniform(
        kb, (Hout, Wout), minval=-bound, maxval=bound, dtype=jnp.float32)
    x = jax.random.normal(kx, (B, Hin, Win), dtype=jnp.float32)

    ref = _reference_forward(x, weights, biases, kernel_mask)

    # --- f32 operand path (exact match with the module semantics) ---
    w_packed, b_packed, tile_h = prepack_params(weights, biases)   # init-time prepack
    out = auto_sparse_linear(x, w_packed, b_packed, kernel_mask, tile_h=tile_h)
    out = jax.block_until_ready(out)
    np.testing.assert_allclose(np.asarray(out), np.asarray(ref), rtol=1e-5, atol=1e-5)
    assert out.shape == (B, Hout, Wout)

    # --- bf16 operand path (MXU-native on v6e/v7x; f32 accumulation & epilogue) ---
    w_bf16, b_bf16, tile_h_bf = prepack_params(weights, biases,
                                               compute_dtype=jnp.bfloat16)
    out_bf16 = auto_sparse_linear(x, w_bf16, b_bf16, kernel_mask, tile_h=tile_h_bf)
    out_bf16 = jax.block_until_ready(out_bf16)
    np.testing.assert_allclose(np.asarray(out_bf16), np.asarray(ref),
                               rtol=5e-2, atol=5e-2)
    assert out_bf16.shape == (B, Hout, Wout)

    print("KERNEL_OK")
</pallas_src>

<mosaic_0001>
module attributes {stable_mosaic.version = 11 : i64} {
  func.func @_sparse_linear_kernel(%arg0: i32, %arg1: memref<72xi32, #tpu.memory_space<smem>>, %arg2: memref<8x8x32xf32, #tpu.memory_space<vmem>>, %arg3: memref<8x96x16xf32, #tpu.memory_space<vmem>>, %arg4: memref<1x1x128xf32, #tpu.memory_space<vmem>>, %arg5: memref<8x128xf32, #tpu.memory_space<vmem>>) attributes {dimension_semantics = [#tpu.dimension_semantics<parallel>], iteration_bounds = array<i64: 3>, scalar_prefetch = 1 : i64, scratch_operands = 0 : i64, tpu.core_type = #tpu.core_type<tc>, window_params = [{pipeline_mode = #tpu.pipeline_mode<synchronous>, transform_indices = @transform_0, window_bounds = array<i64: 8, 8, 32>}, {transform_indices = @transform_1, window_bounds = array<i64: 8, 96, 16>}, {transform_indices = @transform_2, window_bounds = array<i64: 1, 1, 128>}, {transform_indices = @transform_3, window_bounds = array<i64: 8, 128>}]} {
    %c8_i32 = arith.constant 8 : i32
    %0 = arith.muli %arg0, %c8_i32 : i32
    %c0_i32 = arith.constant 0 : i32
    %1 = arith.addi %0, %c0_i32 : i32
    %c3_i32 = arith.constant 3 : i32
    %2 = arith.muli %1, %c3_i32 : i32
    %c0_i32_0 = arith.constant 0 : i32
    %3 = arith.addi %2, %c0_i32_0 : i32
    %4 = arith.index_cast %3 : i32 to index
    %5 = memref.load %arg1[%4] : memref<72xi32, #tpu.memory_space<smem>>
    %6 = arith.index_cast %5 : i32 to index
    %c0 = arith.constant 0 : index
    %c0_1 = arith.constant 0 : index
    %7 = vector.load %arg2[%6, %c0, %c0_1] : memref<8x8x32xf32, #tpu.memory_space<vmem>>, vector<1x8x32xf32>
    %8 = vector.shape_cast %7 : vector<1x8x32xf32> to vector<8x32xf32>
    %c0_2 = arith.constant 0 : index
    %c0_3 = arith.constant 0 : index
    %c0_4 = arith.constant 0 : index
    %9 = vector.load %arg3[%c0_2, %c0_3, %c0_4] : memref<8x96x16xf32, #tpu.memory_space<vmem>>, vector<1x32x16xf32>
    %10 = vector.shape_cast %9 : vector<1x32x16xf32> to vector<32x16xf32>
    %cst = arith.constant dense<0.000000e+00> : vector<8x16xf32>
    %11 = tpu.matmul %8, %10, %cst {dimension_numbers = #tpu.dot_dimension_numbers<[1], [0], [0], [1], [0, 0, 1, 1], [], []>} : vector<8x32xf32>, vector<32x16xf32>, vector<8x16xf32> -> vector<8x16xf32>
    %c3_i32_5 = arith.constant 3 : i32
    %12 = arith.muli %1, %c3_i32_5 : i32
    %c1_i32 = arith.constant 1 : i32
    %13 = arith.addi %12, %c1_i32 : i32
    %14 = arith.index_cast %13 : i32 to index
    %15 = memref.load %arg1[%14] : memref<72xi32, #tpu.memory_space<smem>>
    %16 = arith.index_cast %15 : i32 to index
    %c0_6 = arith.constant 0 : index
    %c0_7 = arith.constant 0 : index
    %17 = vector.load %arg2[%16, %c0_6, %c0_7] : memref<8x8x32xf32, #tpu.memory_space<vmem>>, vector<1x8x32xf32>
    %18 = vector.shape_cast %17 : vector<1x8x32xf32> to vector<8x32xf32>
    %c0_8 = arith.constant 0 : index
    %c32 = arith.constant 32 : index
    %c0_9 = arith.constant 0 : index
    %19 = vector.load %arg3[%c0_8, %c32, %c0_9] : memref<8x96x16xf32, #tpu.memory_space<vmem>>, vector<1x32x16xf32>
    %20 = vector.shape_cast %19 : vector<1x32x16xf32> to vector<32x16xf32>
    %cst_10 = arith.constant dense<0.000000e+00> : vector<8x16xf32>
    %21 = tpu.matmul %18, %20, %cst_10 {dimension_numbers = #tpu.dot_dimension_numbers<[1], [0], [0], [1], [0, 0, 1, 1], [], []>} : vector<8x32xf32>, vector<32x16xf32>, vector<8x16xf32> -> vector<8x16xf32>
    %22 = arith.addf %11, %21 : vector<8x16xf32>
    %c3_i32_11 = arith.constant 3 : i32
    %23 = arith.muli %1, %c3_i32_11 : i32
    %c2_i32 = arith.constant 2 : i32
    %24 = arith.addi %23, %c2_i32 : i32
    %25 = arith.index_cast %24 : i32 to index
    %26 = memref.load %arg1[%25] : memref<72xi32, #tpu.memory_space<smem>>
    %27 = arith.index_cast %26 : i32 to index
    %c0_12 = arith.constant 0 : index
    %c0_13 = arith.constant 0 : index
    %28 = vector.load %arg2[%27, %c0_12, %c0_13] : memref<8x8x32xf32, #tpu.memory_space<vmem>>, vector<1x8x32xf32>
    %29 = vector.shape_cast %28 : vector<1x8x32xf32> to vector<8x32xf32>
    %c0_14 = arith.constant 0 : index
    %c64 = arith.constant 64 : index
    %c0_15 = arith.constant 0 : index
    %30 = vector.load %arg3[%c0_14, %c64, %c0_15] : memref<8x96x16xf32, #tpu.memory_space<vmem>>, vector<1x32x16xf32>
    %31 = vector.shape_cast %30 : vector<1x32x16xf32> to vector<32x16xf32>
    %cst_16 = arith.constant dense<0.000000e+00> : vector<8x16xf32>
    %32 = tpu.matmul %29, %31, %cst_16 {dimension_numbers = #tpu.dot_dimension_numbers<[1], [0], [0], [1], [0, 0, 1, 1], [], []>} : vector<8x32xf32>, vector<32x16xf32>, vector<8x16xf32> -> vector<8x16xf32>
    %33 = arith.addf %22, %32 : vector<8x16xf32>
    %c8_i32_17 = arith.constant 8 : i32
    %34 = arith.muli %arg0, %c8_i32_17 : i32
    %c1_i32_18 = arith.constant 1 : i32
    %35 = arith.addi %34, %c1_i32_18 : i32
    %c3_i32_19 = arith.constant 3 : i32
    %36 = arith.muli %35, %c3_i32_19 : i32
    %c0_i32_20 = arith.constant 0 : i32
    %37 = arith.addi %36, %c0_i32_20 : i32
    %38 = arith.index_cast %37 : i32 to index
    %39 = memref.load %arg1[%38] : memref<72xi32, #tpu.memory_space<smem>>
    %40 = arith.index_cast %39 : i32 to index
    %c0_21 = arith.constant 0 : index
    %c0_22 = arith.constant 0 : index
    %41 = vector.load %arg2[%40, %c0_21, %c0_22] : memref<8x8x32xf32, #tpu.memory_space<vmem>>, vector<1x8x32xf32>
    %42 = vector.shape_cast %41 : vector<1x8x32xf32> to vector<8x32xf32>
    %c1 = arith.constant 1 : index
    %c0_23 = arith.constant 0 : index
    %c0_24 = arith.constant 0 : index
    %43 = vector.load %arg3[%c1, %c0_23, %c0_24] : memref<8x96x16xf32, #tpu.memory_space<vmem>>, vector<1x32x16xf32>
    %44 = vector.shape_cast %43 : vector<1x32x16xf32> to vector<32x16xf32>
    %cst_25 = arith.constant dense<0.000000e+00> : vector<8x16xf32>
    %45 = tpu.matmul %42, %44, %cst_25 {dimension_numbers = #tpu.dot_dimension_numbers<[1], [0], [0], [1], [0, 0, 1, 1], [], []>} : vector<8x32xf32>, vector<32x16xf32>, vector<8x16xf32> -> vector<8x16xf32>
    %c3_i32_26 = arith.constant 3 : i32
    %46 = arith.muli %35, %c3_i32_26 : i32
    %c1_i32_27 = arith.constant 1 : i32
    %47 = arith.addi %46, %c1_i32_27 : i32
    %48 = arith.index_cast %47 : i32 to index
    %49 = memref.load %arg1[%48] : memref<72xi32, #tpu.memory_space<smem>>
    %50 = arith.index_cast %49 : i32 to index
    %c0_28 = arith.constant 0 : index
    %c0_29 = arith.constant 0 : index
    %51 = vector.load %arg2[%50, %c0_28, %c0_29] : memref<8x8x32xf32, #tpu.memory_space<vmem>>, vector<1x8x32xf32>
    %52 = vector.shape_cast %51 : vector<1x8x32xf32> to vector<8x32xf32>
    %c1_30 = arith.constant 1 : index
    %c32_31 = arith.constant 32 : index
    %c0_32 = arith.constant 0 : index
    %53 = vector.load %arg3[%c1_30, %c32_31, %c0_32] : memref<8x96x16xf32, #tpu.memory_space<vmem>>, vector<1x32x16xf32>
    %54 = vector.shape_cast %53 : vector<1x32x16xf32> to vector<32x16xf32>
    %cst_33 = arith.constant dense<0.000000e+00> : vector<8x16xf32>
    %55 = tpu.matmul %52, %54, %cst_33 {dimension_numbers = #tpu.dot_dimension_numbers<[1], [0], [0], [1], [0, 0, 1, 1], [], []>} : vector<8x32xf32>, vector<32x16xf32>, vector<8x16xf32> -> vector<8x16xf32>
    %56 = arith.addf %45, %55 : vector<8x16xf32>
    %c3_i32_34 = arith.constant 3 : i32
    %57 = arith.muli %35, %c3_i32_34 : i32
    %c2_i32_35 = arith.constant 2 : i32
    %58 = arith.addi %57, %c2_i32_35 : i32
    %59 = arith.index_cast %58 : i32 to index
    %60 = memref.load %arg1[%59] : memref<72xi32, #tpu.memory_space<smem>>
    %61 = arith.index_cast %60 : i32 to index
    %c0_36 = arith.constant 0 : index
    %c0_37 = arith.constant 0 : index
    %62 = vector.load %arg2[%61, %c0_36, %c0_37] : memref<8x8x32xf32, #tpu.memory_space<vmem>>, vector<1x8x32xf32>
    %63 = vector.shape_cast %62 : vector<1x8x32xf32> to vector<8x32xf32>
    %c1_38 = arith.constant 1 : index
    %c64_39 = arith.constant 64 : index
    %c0_40 = arith.constant 0 : index
    %64 = vector.load %arg3[%c1_38, %c64_39, %c0_40] : memref<8x96x16xf32, #tpu.memory_space<vmem>>, vector<1x32x16xf32>
    %65 = vector.shape_cast %64 : vector<1x32x16xf32> to vector<32x16xf32>
    %cst_41 = arith.constant dense<0.000000e+00> : vector<8x16xf32>
    %66 = tpu.matmul %63, %65, %cst_41 {dimension_numbers = #tpu.dot_dimension_numbers<[1], [0], [0], [1], [0, 0, 1, 1], [], []>} : vector<8x32xf32>, vector<32x16xf32>, vector<8x16xf32> -> vector<8x16xf32>
    %67 = arith.addf %56, %66 : vector<8x16xf32>
    %c8_i32_42 = arith.constant 8 : i32
    %68 = arith.muli %arg0, %c8_i32_42 : i32
    %c2_i32_43 = arith.constant 2 : i32
    %69 = arith.addi %68, %c2_i32_43 : i32
    %c3_i32_44 = arith.constant 3 : i32
    %70 = arith.muli %69, %c3_i32_44 : i32
    %c0_i32_45 = arith.constant 0 : i32
    %71 = arith.addi %70, %c0_i32_45 : i32
    %72 = arith.index_cast %71 : i32 to index
    %73 = memref.load %arg1[%72] : memref<72xi32, #tpu.memory_space<smem>>
    %74 = arith.index_cast %73 : i32 to index
    %c0_46 = arith.constant 0 : index
    %c0_47 = arith.constant 0 : index
    %75 = vector.load %arg2[%74, %c0_46, %c0_47] : memref<8x8x32xf32, #tpu.memory_space<vmem>>, vector<1x8x32xf32>
    %76 = vector.shape_cast %75 : vector<1x8x32xf32> to vector<8x32xf32>
    %c2 = arith.constant 2 : index
    %c0_48 = arith.constant 0 : index
    %c0_49 = arith.constant 0 : index
    %77 = vector.load %arg3[%c2, %c0_48, %c0_49] : memref<8x96x16xf32, #tpu.memory_space<vmem>>, vector<1x32x16xf32>
    %78 = vector.shape_cast %77 : vector<1x32x16xf32> to vector<32x16xf32>
    %cst_50 = arith.constant dense<0.000000e+00> : vector<8x16xf32>
    %79 = tpu.matmul %76, %78, %cst_50 {dimension_numbers = #tpu.dot_dimension_numbers<[1], [0], [0], [1], [0, 0, 1, 1], [], []>} : vector<8x32xf32>, vector<32x16xf32>, vector<8x16xf32> -> vector<8x16xf32>
    %c3_i32_51 = arith.constant 3 : i32
    %80 = arith.muli %69, %c3_i32_51 : i32
    %c1_i32_52 = arith.constant 1 : i32
    %81 = arith.addi %80, %c1_i32_52 : i32
    %82 = arith.index_cast %81 : i32 to index
    %83 = memref.load %arg1[%82] : memref<72xi32, #tpu.memory_space<smem>>
    %84 = arith.index_cast %83 : i32 to index
    %c0_53 = arith.constant 0 : index
    %c0_54 = arith.constant 0 : index
    %85 = vector.load %arg2[%84, %c0_53, %c0_54] : memref<8x8x32xf32, #tpu.memory_space<vmem>>, vector<1x8x32xf32>
    %86 = vector.shape_cast %85 : vector<1x8x32xf32> to vector<8x32xf32>
    %c2_55 = arith.constant 2 : index
    %c32_56 = arith.constant 32 : index
    %c0_57 = arith.constant 0 : index
    %87 = vector.load %arg3[%c2_55, %c32_56, %c0_57] : memref<8x96x16xf32, #tpu.memory_space<vmem>>, vector<1x32x16xf32>
    %88 = vector.shape_cast %87 : vector<1x32x16xf32> to vector<32x16xf32>
    %cst_58 = arith.constant dense<0.000000e+00> : vector<8x16xf32>
    %89 = tpu.matmul %86, %88, %cst_58 {dimension_numbers = #tpu.dot_dimension_numbers<[1], [0], [0], [1], [0, 0, 1, 1], [], []>} : vector<8x32xf32>, vector<32x16xf32>, vector<8x16xf32> -> vector<8x16xf32>
    %90 = arith.addf %79, %89 : vector<8x16xf32>
    %c3_i32_59 = arith.constant 3 : i32
    %91 = arith.muli %69, %c3_i32_59 : i32
    %c2_i32_60 = arith.constant 2 : i32
    %92 = arith.addi %91, %c2_i32_60 : i32
    %93 = arith.index_cast %92 : i32 to index
    %94 = memref.load %arg1[%93] : memref<72xi32, #tpu.memory_space<smem>>
    %95 = arith.index_cast %94 : i32 to index
    %c0_61 = arith.constant 0 : index
    %c0_62 = arith.constant 0 : index
    %96 = vector.load %arg2[%95, %c0_61, %c0_62] : memref<8x8x32xf32, #tpu.memory_space<vmem>>, vector<1x8x32xf32>
    %97 = vector.shape_cast %96 : vector<1x8x32xf32> to vector<8x32xf32>
    %c2_63 = arith.constant 2 : index
    %c64_64 = arith.constant 64 : index
    %c0_65 = arith.constant 0 : index
    %98 = vector.load %arg3[%c2_63, %c64_64, %c0_65] : memref<8x96x16xf32, #tpu.memory_space<vmem>>, vector<1x32x16xf32>
    %99 = vector.shape_cast %98 : vector<1x32x16xf32> to vector<32x16xf32>
    %cst_66 = arith.constant dense<0.000000e+00> : vector<8x16xf32>
    %100 = tpu.matmul %97, %99, %cst_66 {dimension_numbers = #tpu.dot_dimension_numbers<[1], [0], [0], [1], [0, 0, 1, 1], [], []>} : vector<8x32xf32>, vector<32x16xf32>, vector<8x16xf32> -> vector<8x16xf32>
    %101 = arith.addf %90, %100 : vector<8x16xf32>
    %c8_i32_67 = arith.constant 8 : i32
    %102 = arith.muli %arg0, %c8_i32_67 : i32
    %c3_i32_68 = arith.constant 3 : i32
    %103 = arith.addi %102, %c3_i32_68 : i32
    %c3_i32_69 = arith.constant 3 : i32
    %104 = arith.muli %103, %c3_i32_69 : i32
    %c0_i32_70 = arith.constant 0 : i32
    %105 = arith.addi %104, %c0_i32_70 : i32
    %106 = arith.index_cast %105 : i32 to index
    %107 = memref.load %arg1[%106] : memref<72xi32, #tpu.memory_space<smem>>
    %108 = arith.index_cast %107 : i32 to index
    %c0_71 = arith.constant 0 : index
    %c0_72 = arith.constant 0 : index
    %109 = vector.load %arg2[%108, %c0_71, %c0_72] : memref<8x8x32xf32, #tpu.memory_space<vmem>>, vector<1x8x32xf32>
    %110 = vector.shape_cast %109 : vector<1x8x32xf32> to vector<8x32xf32>
    %c3 = arith.constant 3 : index
    %c0_73 = arith.constant 0 : index
    %c0_74 = arith.constant 0 : index
    %111 = vector.load %arg3[%c3, %c0_73, %c0_74] : memref<8x96x16xf32, #tpu.memory_space<vmem>>, vector<1x32x16xf32>
    %112 = vector.shape_cast %111 : vector<1x32x16xf32> to vector<32x16xf32>
    %cst_75 = arith.constant dense<0.000000e+00> : vector<8x16xf32>
    %113 = tpu.matmul %110, %112, %cst_75 {dimension_numbers = #tpu.dot_dimension_numbers<[1], [0], [0], [1], [0, 0, 1, 1], [], []>} : vector<8x32xf32>, vector<32x16xf32>, vector<8x16xf32> -> vector<8x16xf32>
    %c3_i32_76 = arith.constant 3 : i32
    %114 = arith.muli %103, %c3_i32_76 : i32
    %c1_i32_77 = arith.constant 1 : i32
    %115 = arith.addi %114, %c1_i32_77 : i32
    %116 = arith.index_cast %115 : i32 to index
    %117 = memref.load %arg1[%116] : memref<72xi32, #tpu.memory_space<smem>>
    %118 = arith.index_cast %117 : i32 to index
    %c0_78 = arith.constant 0 : index
    %c0_79 = arith.constant 0 : index
    %119 = vector.load %arg2[%118, %c0_78, %c0_79] : memref<8x8x32xf32, #tpu.memory_space<vmem>>, vector<1x8x32xf32>
    %120 = vector.shape_cast %119 : vector<1x8x32xf32> to vector<8x32xf32>
    %c3_80 = arith.constant 3 : index
    %c32_81 = arith.constant 32 : index
    %c0_82 = arith.constant 0 : index
    %121 = vector.load %arg3[%c3_80, %c32_81, %c0_82] : memref<8x96x16xf32, #tpu.memory_space<vmem>>, vector<1x32x16xf32>
    %122 = vector.shape_cast %121 : vector<1x32x16xf32> to vector<32x16xf32>
    %cst_83 = arith.constant dense<0.000000e+00> : vector<8x16xf32>
    %123 = tpu.matmul %120, %122, %cst_83 {dimension_numbers = #tpu.dot_dimension_numbers<[1], [0], [0], [1], [0, 0, 1, 1], [], []>} : vector<8x32xf32>, vector<32x16xf32>, vector<8x16xf32> -> vector<8x16xf32>
    %124 = arith.addf %113, %123 : vector<8x16xf32>
    %c3_i32_84 = arith.constant 3 : i32
    %125 = arith.muli %103, %c3_i32_84 : i32
    %c2_i32_85 = arith.constant 2 : i32
    %126 = arith.addi %125, %c2_i32_85 : i32
    %127 = arith.index_cast %126 : i32 to index
    %128 = memref.load %arg1[%127] : memref<72xi32, #tpu.memory_space<smem>>
    %129 = arith.index_cast %128 : i32 to index
    %c0_86 = arith.constant 0 : index
    %c0_87 = arith.constant 0 : index
    %130 = vector.load %arg2[%129, %c0_86, %c0_87] : memref<8x8x32xf32, #tpu.memory_space<vmem>>, vector<1x8x32xf32>
    %131 = vector.shape_cast %130 : vector<1x8x32xf32> to vector<8x32xf32>
    %c3_88 = arith.constant 3 : index
    %c64_89 = arith.constant 64 : index
    %c0_90 = arith.constant 0 : index
    %132 = vector.load %arg3[%c3_88, %c64_89, %c0_90] : memref<8x96x16xf32, #tpu.memory_space<vmem>>, vector<1x32x16xf32>
    %133 = vector.shape_cast %132 : vector<1x32x16xf32> to vector<32x16xf32>
    %cst_91 = arith.constant dense<0.000000e+00> : vector<8x16xf32>
    %134 = tpu.matmul %131, %133, %cst_91 {dimension_numbers = #tpu.dot_dimension_numbers<[1], [0], [0], [1], [0, 0, 1, 1], [], []>} : vector<8x32xf32>, vector<32x16xf32>, vector<8x16xf32> -> vector<8x16xf32>
    %135 = arith.addf %124, %134 : vector<8x16xf32>
    %c8_i32_92 = arith.constant 8 : i32
    %136 = arith.muli %arg0, %c8_i32_92 : i32
    %c4_i32 = arith.constant 4 : i32
    %137 = arith.addi %136, %c4_i32 : i32
    %c3_i32_93 = arith.constant 3 : i32
    %138 = arith.muli %137, %c3_i32_93 : i32
    %c0_i32_94 = arith.constant 0 : i32
    %139 = arith.addi %138, %c0_i32_94 : i32
    %140 = arith.index_cast %139 : i32 to index
    %141 = memref.load %arg1[%140] : memref<72xi32, #tpu.memory_space<smem>>
    %142 = arith.index_cast %141 : i32 to index
    %c0_95 = arith.constant 0 : index
    %c0_96 = arith.constant 0 : index
    %143 = vector.load %arg2[%142, %c0_95, %c0_96] : memref<8x8x32xf32, #tpu.memory_space<vmem>>, vector<1x8x32xf32>
    %144 = vector.shape_cast %143 : vector<1x8x32xf32> to vector<8x32xf32>
    %c4 = arith.constant 4 : index
    %c0_97 = arith.constant 0 : index
    %c0_98 = arith.constant 0 : index
    %145 = vector.load %arg3[%c4, %c0_97, %c0_98] : memref<8x96x16xf32, #tpu.memory_space<vmem>>, vector<1x32x16xf32>
    %146 = vector.shape_cast %145 : vector<1x32x16xf32> to vector<32x16xf32>
    %cst_99 = arith.constant dense<0.000000e+00> : vector<8x16xf32>
    %147 = tpu.matmul %144, %146, %cst_99 {dimension_numbers = #tpu.dot_dimension_numbers<[1], [0], [0], [1], [0, 0, 1, 1], [], []>} : vector<8x32xf32>, vector<32x16xf32>, vector<8x16xf32> -> vector<8x16xf32>
    %c3_i32_100 = arith.constant 3 : i32
    %148 = arith.muli %137, %c3_i32_100 : i32
    %c1_i32_101 = arith.constant 1 : i32
    %149 = arith.addi %148, %c1_i32_101 : i32
    %150 = arith.index_cast %149 : i32 to index
    %151 = memref.load %arg1[%150] : memref<72xi32, #tpu.memory_space<smem>>
    %152 = arith.index_cast %151 : i32 to index
    %c0_102 = arith.constant 0 : index
    %c0_103 = arith.constant 0 : index
    %153 = vector.load %arg2[%152, %c0_102, %c0_103] : memref<8x8x32xf32, #tpu.memory_space<vmem>>, vector<1x8x32xf32>
    %154 = vector.shape_cast %153 : vector<1x8x32xf32> to vector<8x32xf32>
    %c4_104 = arith.constant 4 : index
    %c32_105 = arith.constant 32 : index
    %c0_106 = arith.constant 0 : index
    %155 = vector.load %arg3[%c4_104, %c32_105, %c0_106] : memref<8x96x16xf32, #tpu.memory_space<vmem>>, vector<1x32x16xf32>
    %156 = vector.shape_cast %155 : vector<1x32x16xf32> to vector<32x16xf32>
    %cst_107 = arith.constant dense<0.000000e+00> : vector<8x16xf32>
    %157 = tpu.matmul %154, %156, %cst_107 {dimension_numbers = #tpu.dot_dimension_numbers<[1], [0], [0], [1], [0, 0, 1, 1], [], []>} : vector<8x32xf32>, vector<32x16xf32>, vector<8x16xf32> -> vector<8x16xf32>
    %158 = arith.addf %147, %157 : vector<8x16xf32>
    %c3_i32_108 = arith.constant 3 : i32
    %159 = arith.muli %137, %c3_i32_108 : i32
    %c2_i32_109 = arith.constant 2 : i32
    %160 = arith.addi %159, %c2_i32_109 : i32
    %161 = arith.index_cast %160 : i32 to index
    %162 = memref.load %arg1[%161] : memref<72xi32, #tpu.memory_space<smem>>
    %163 = arith.index_cast %162 : i32 to index
    %c0_110 = arith.constant 0 : index
    %c0_111 = arith.constant 0 : index
    %164 = vector.load %arg2[%163, %c0_110, %c0_111] : memref<8x8x32xf32, #tpu.memory_space<vmem>>, vector<1x8x32xf32>
    %165 = vector.shape_cast %164 : vector<1x8x32xf32> to vector<8x32xf32>
    %c4_112 = arith.constant 4 : index
    %c64_113 = arith.constant 64 : index
    %c0_114 = arith.constant 0 : index
    %166 = vector.load %arg3[%c4_112, %c64_113, %c0_114] : memref<8x96x16xf32, #tpu.memory_space<vmem>>, vector<1x32x16xf32>
    %167 = vector.shape_cast %166 : vector<1x32x16xf32> to vector<32x16xf32>
    %cst_115 = arith.constant dense<0.000000e+00> : vector<8x16xf32>
    %168 = tpu.matmul %165, %167, %cst_115 {dimension_numbers = #tpu.dot_dimension_numbers<[1], [0], [0], [1], [0, 0, 1, 1], [], []>} : vector<8x32xf32>, vector<32x16xf32>, vector<8x16xf32> -> vector<8x16xf32>
    %169 = arith.addf %158, %168 : vector<8x16xf32>
    %c8_i32_116 = arith.constant 8 : i32
    %170 = arith.muli %arg0, %c8_i32_116 : i32
    %c5_i32 = arith.constant 5 : i32
    %171 = arith.addi %170, %c5_i32 : i32
    %c3_i32_117 = arith.constant 3 : i32
    %172 = arith.muli %171, %c3_i32_117 : i32
    %c0_i32_118 = arith.constant 0 : i32
    %173 = arith.addi %172, %c0_i32_118 : i32
    %174 = arith.index_cast %173 : i32 to index
    %175 = memref.load %arg1[%174] : memref<72xi32, #tpu.memory_space<smem>>
    %176 = arith.index_cast %175 : i32 to index
    %c0_119 = arith.constant 0 : index
    %c0_120 = arith.constant 0 : index
    %177 = vector.load %arg2[%176, %c0_119, %c0_120] : memref<8x8x32xf32, #tpu.memory_space<vmem>>, vector<1x8x32xf32>
    %178 = vector.shape_cast %177 : vector<1x8x32xf32> to vector<8x32xf32>
    %c5 = arith.constant 5 : index
    %c0_121 = arith.constant 0 : index
    %c0_122 = arith.constant 0 : index
    %179 = vector.load %arg3[%c5, %c0_121, %c0_122] : memref<8x96x16xf32, #tpu.memory_space<vmem>>, vector<1x32x16xf32>
    %180 = vector.shape_cast %179 : vector<1x32x16xf32> to vector<32x16xf32>
    %cst_123 = arith.constant dense<0.000000e+00> : vector<8x16xf32>
    %181 = tpu.matmul %178, %180, %cst_123 {dimension_numbers = #tpu.dot_dimension_numbers<[1], [0], [0], [1], [0, 0, 1, 1], [], []>} : vector<8x32xf32>, vector<32x16xf32>, vector<8x16xf32> -> vector<8x16xf32>
    %c3_i32_124 = arith.constant 3 : i32
    %182 = arith.muli %171, %c3_i32_124 : i32
    %c1_i32_125 = arith.constant 1 : i32
    %183 = arith.addi %182, %c1_i32_125 : i32
    %184 = arith.index_cast %183 : i32 to index
    %185 = memref.load %arg1[%184] : memref<72xi32, #tpu.memory_space<smem>>
    %186 = arith.index_cast %185 : i32 to index
    %c0_126 = arith.constant 0 : index
    %c0_127 = arith.constant 0 : index
    %187 = vector.load %arg2[%186, %c0_126, %c0_127] : memref<8x8x32xf32, #tpu.memory_space<vmem>>, vector<1x8x32xf32>
    %188 = vector.shape_cast %187 : vector<1x8x32xf32> to vector<8x32xf32>
    %c5_128 = arith.constant 5 : index
    %c32_129 = arith.constant 32 : index
    %c0_130 = arith.constant 0 : index
    %189 = vector.load %arg3[%c5_128, %c32_129, %c0_130] : memref<8x96x16xf32, #tpu.memory_space<vmem>>, vector<1x32x16xf32>
    %190 = vector.shape_cast %189 : vector<1x32x16xf32> to vector<32x16xf32>
    %cst_131 = arith.constant dense<0.000000e+00> : vector<8x16xf32>
    %191 = tpu.matmul %188, %190, %cst_131 {dimension_numbers = #tpu.dot_dimension_numbers<[1], [0], [0], [1], [0, 0, 1, 1], [], []>} : vector<8x32xf32>, vector<32x16xf32>, vector<8x16xf32> -> vector<8x16xf32>
    %192 = arith.addf %181, %191 : vector<8x16xf32>
    %c3_i32_132 = arith.constant 3 : i32
    %193 = arith.muli %171, %c3_i32_132 : i32
    %c2_i32_133 = arith.constant 2 : i32
    %194 = arith.addi %193, %c2_i32_133 : i32
    %195 = arith.index_cast %194 : i32 to index
    %196 = memref.load %arg1[%195] : memref<72xi32, #tpu.memory_space<smem>>
    %197 = arith.index_cast %196 : i32 to index
    %c0_134 = arith.constant 0 : index
    %c0_135 = arith.constant 0 : index
    %198 = vector.load %arg2[%197, %c0_134, %c0_135] : memref<8x8x32xf32, #tpu.memory_space<vmem>>, vector<1x8x32xf32>
    %199 = vector.shape_cast %198 : vector<1x8x32xf32> to vector<8x32xf32>
    %c5_136 = arith.constant 5 : index
    %c64_137 = arith.constant 64 : index
    %c0_138 = arith.constant 0 : index
    %200 = vector.load %arg3[%c5_136, %c64_137, %c0_138] : memref<8x96x16xf32, #tpu.memory_space<vmem>>, vector<1x32x16xf32>
    %201 = vector.shape_cast %200 : vector<1x32x16xf32> to vector<32x16xf32>
    %cst_139 = arith.constant dense<0.000000e+00> : vector<8x16xf32>
    %202 = tpu.matmul %199, %201, %cst_139 {dimension_numbers = #tpu.dot_dimension_numbers<[1], [0], [0], [1], [0, 0, 1, 1], [], []>} : vector<8x32xf32>, vector<32x16xf32>, vector<8x16xf32> -> vector<8x16xf32>
    %203 = arith.addf %192, %202 : vector<8x16xf32>
    %c8_i32_140 = arith.constant 8 : i32
    %204 = arith.muli %arg0, %c8_i32_140 : i32
    %c6_i32 = arith.constant 6 : i32
    %205 = arith.addi %204, %c6_i32 : i32
    %c3_i32_141 = arith.constant 3 : i32
    %206 = arith.muli %205, %c3_i32_141 : i32
    %c0_i32_142 = arith.constant 0 : i32
    %207 = arith.addi %206, %c0_i32_142 : i32
    %208 = arith.index_cast %207 : i32 to index
    %209 = memref.load %arg1[%208] : memref<72xi32, #tpu.memory_space<smem>>
    %210 = arith.index_cast %209 : i32 to index
    %c0_143 = arith.constant 0 : index
    %c0_144 = arith.constant 0 : index
    %211 = vector.load %arg2[%210, %c0_143, %c0_144] : memref<8x8x32xf32, #tpu.memory_space<vmem>>, vector<1x8x32xf32>
    %212 = vector.shape_cast %211 : vector<1x8x32xf32> to vector<8x32xf32>
    %c6 = arith.constant 6 : index
    %c0_145 = arith.constant 0 : index
    %c0_146 = arith.constant 0 : index
    %213 = vector.load %arg3[%c6, %c0_145, %c0_146] : memref<8x96x16xf32, #tpu.memory_space<vmem>>, vector<1x32x16xf32>
    %214 = vector.shape_cast %213 : vector<1x32x16xf32> to vector<32x16xf32>
    %cst_147 = arith.constant dense<0.000000e+00> : vector<8x16xf32>
    %215 = tpu.matmul %212, %214, %cst_147 {dimension_numbers = #tpu.dot_dimension_numbers<[1], [0], [0], [1], [0, 0, 1, 1], [], []>} : vector<8x32xf32>, vector<32x16xf32>, vector<8x16xf32> -> vector<8x16xf32>
    %c3_i32_148 = arith.constant 3 : i32
    %216 = arith.muli %205, %c3_i32_148 : i32
    %c1_i32_149 = arith.constant 1 : i32
    %217 = arith.addi %216, %c1_i32_149 : i32
    %218 = arith.index_cast %217 : i32 to index
    %219 = memref.load %arg1[%218] : memref<72xi32, #tpu.memory_space<smem>>
    %220 = arith.index_cast %219 : i32 to index
    %c0_150 = arith.constant 0 : index
    %c0_151 = arith.constant 0 : index
    %221 = vector.load %arg2[%220, %c0_150, %c0_151] : memref<8x8x32xf32, #tpu.memory_space<vmem>>, vector<1x8x32xf32>
    %222 = vector.shape_cast %221 : vector<1x8x32xf32> to vector<8x32xf32>
    %c6_152 = arith.constant 6 : index
    %c32_153 = arith.constant 32 : index
    %c0_154 = arith.constant 0 : index
    %223 = vector.load %arg3[%c6_152, %c32_153, %c0_154] : memref<8x96x16xf32, #tpu.memory_space<vmem>>, vector<1x32x16xf32>
    %224 = vector.shape_cast %223 : vector<1x32x16xf32> to vector<32x16xf32>
    %cst_155 = arith.constant dense<0.000000e+00> : vector<8x16xf32>
    %225 = tpu.matmul %222, %224, %cst_155 {dimension_numbers = #tpu.dot_dimension_numbers<[1], [0], [0], [1], [0, 0, 1, 1], [], []>} : vector<8x32xf32>, vector<32x16xf32>, vector<8x16xf32> -> vector<8x16xf32>
    %226 = arith.addf %215, %225 : vector<8x16xf32>
    %c3_i32_156 = arith.constant 3 : i32
    %227 = arith.muli %205, %c3_i32_156 : i32
    %c2_i32_157 = arith.constant 2 : i32
    %228 = arith.addi %227, %c2_i32_157 : i32
    %229 = arith.index_cast %228 : i32 to index
    %230 = memref.load %arg1[%229] : memref<72xi32, #tpu.memory_space<smem>>
    %231 = arith.index_cast %230 : i32 to index
    %c0_158 = arith.constant 0 : index
    %c0_159 = arith.constant 0 : index
    %232 = vector.load %arg2[%231, %c0_158, %c0_159] : memref<8x8x32xf32, #tpu.memory_space<vmem>>, vector<1x8x32xf32>
    %233 = vector.shape_cast %232 : vector<1x8x32xf32> to vector<8x32xf32>
    %c6_160 = arith.constant 6 : index
    %c64_161 = arith.constant 64 : index
    %c0_162 = arith.constant 0 : index
    %234 = vector.load %arg3[%c6_160, %c64_161, %c0_162] : memref<8x96x16xf32, #tpu.memory_space<vmem>>, vector<1x32x16xf32>
    %235 = vector.shape_cast %234 : vector<1x32x16xf32> to vector<32x16xf32>
    %cst_163 = arith.constant dense<0.000000e+00> : vector<8x16xf32>
    %236 = tpu.matmul %233, %235, %cst_163 {dimension_numbers = #tpu.dot_dimension_numbers<[1], [0], [0], [1], [0, 0, 1, 1], [], []>} : vector<8x32xf32>, vector<32x16xf32>, vector<8x16xf32> -> vector<8x16xf32>
    %237 = arith.addf %226, %236 : vector<8x16xf32>
    %c8_i32_164 = arith.constant 8 : i32
    %238 = arith.muli %arg0, %c8_i32_164 : i32
    %c7_i32 = arith.constant 7 : i32
    %239 = arith.addi %238, %c7_i32 : i32
    %c3_i32_165 = arith.constant 3 : i32
    %240 = arith.muli %239, %c3_i32_165 : i32
    %c0_i32_166 = arith.constant 0 : i32
    %241 = arith.addi %240, %c0_i32_166 : i32
    %242 = arith.index_cast %241 : i32 to index
    %243 = memref.load %arg1[%242] : memref<72xi32, #tpu.memory_space<smem>>
    %244 = arith.index_cast %243 : i32 to index
    %c0_167 = arith.constant 0 : index
    %c0_168 = arith.constant 0 : index
    %245 = vector.load %arg2[%244, %c0_167, %c0_168] : memref<8x8x32xf32, #tpu.memory_space<vmem>>, vector<1x8x32xf32>
    %246 = vector.shape_cast %245 : vector<1x8x32xf32> to vector<8x32xf32>
    %c7 = arith.constant 7 : index
    %c0_169 = arith.constant 0 : index
    %c0_170 = arith.constant 0 : index
    %247 = vector.load %arg3[%c7, %c0_169, %c0_170] : memref<8x96x16xf32, #tpu.memory_space<vmem>>, vector<1x32x16xf32>
    %248 = vector.shape_cast %247 : vector<1x32x16xf32> to vector<32x16xf32>
    %cst_171 = arith.constant dense<0.000000e+00> : vector<8x16xf32>
    %249 = tpu.matmul %246, %248, %cst_171 {dimension_numbers = #tpu.dot_dimension_numbers<[1], [0], [0], [1], [0, 0, 1, 1], [], []>} : vector<8x32xf32>, vector<32x16xf32>, vector<8x16xf32> -> vector<8x16xf32>
    %c3_i32_172 = arith.constant 3 : i32
    %250 = arith.muli %239, %c3_i32_172 : i32
    %c1_i32_173 = arith.constant 1 : i32
    %251 = arith.addi %250, %c1_i32_173 : i32
    %252 = arith.index_cast %251 : i32 to index
    %253 = memref.load %arg1[%252] : memref<72xi32, #tpu.memory_space<smem>>
    %254 = arith.index_cast %253 : i32 to index
    %c0_174 = arith.constant 0 : index
    %c0_175 = arith.constant 0 : index
    %255 = vector.load %arg2[%254, %c0_174, %c0_175] : memref<8x8x32xf32, #tpu.memory_space<vmem>>, vector<1x8x32xf32>
    %256 = vector.shape_cast %255 : vector<1x8x32xf32> to vector<8x32xf32>
    %c7_176 = arith.constant 7 : index
    %c32_177 = arith.constant 32 : index
    %c0_178 = arith.constant 0 : index
    %257 = vector.load %arg3[%c7_176, %c32_177, %c0_178] : memref<8x96x16xf32, #tpu.memory_space<vmem>>, vector<1x32x16xf32>
    %258 = vector.shape_cast %257 : vector<1x32x16xf32> to vector<32x16xf32>
    %cst_179 = arith.constant dense<0.000000e+00> : vector<8x16xf32>
    %259 = tpu.matmul %256, %258, %cst_179 {dimension_numbers = #tpu.dot_dimension_numbers<[1], [0], [0], [1], [0, 0, 1, 1], [], []>} : vector<8x32xf32>, vector<32x16xf32>, vector<8x16xf32> -> vector<8x16xf32>
    %260 = arith.addf %249, %259 : vector<8x16xf32>
    %c3_i32_180 = arith.constant 3 : i32
    %261 = arith.muli %239, %c3_i32_180 : i32
    %c2_i32_181 = arith.constant 2 : i32
    %262 = arith.addi %261, %c2_i32_181 : i32
    %263 = arith.index_cast %262 : i32 to index
    %264 = memref.load %arg1[%263] : memref<72xi32, #tpu.memory_space<smem>>
    %265 = arith.index_cast %264 : i32 to index
    %c0_182 = arith.constant 0 : index
    %c0_183 = arith.constant 0 : index
    %266 = vector.load %arg2[%265, %c0_182, %c0_183] : memref<8x8x32xf32, #tpu.memory_space<vmem>>, vector<1x8x32xf32>
    %267 = vector.shape_cast %266 : vector<1x8x32xf32> to vector<8x32xf32>
    %c7_184 = arith.constant 7 : index
    %c64_185 = arith.constant 64 : index
    %c0_186 = arith.constant 0 : index
    %268 = vector.load %arg3[%c7_184, %c64_185, %c0_186] : memref<8x96x16xf32, #tpu.memory_space<vmem>>, vector<1x32x16xf32>
    %269 = vector.shape_cast %268 : vector<1x32x16xf32> to vector<32x16xf32>
    %cst_187 = arith.constant dense<0.000000e+00> : vector<8x16xf32>
    %270 = tpu.matmul %267, %269, %cst_187 {dimension_numbers = #tpu.dot_dimension_numbers<[1], [0], [0], [1], [0, 0, 1, 1], [], []>} : vector<8x32xf32>, vector<32x16xf32>, vector<8x16xf32> -> vector<8x16xf32>
    %271 = arith.addf %260, %270 : vector<8x16xf32>
    %272 = tpu.concatenate %33, %67, %101, %135, %169, %203, %237, %271 in 1 : vector<8x16xf32>, vector<8x16xf32>, vector<8x16xf32>, vector<8x16xf32>, vector<8x16xf32>, vector<8x16xf32>, vector<8x16xf32>, vector<8x16xf32> -> vector<8x128xf32>
    %c0_188 = arith.constant 0 : index
    %c0_189 = arith.constant 0 : index
    %c0_190 = arith.constant 0 : index
    %273 = vector.load %arg4[%c0_188, %c0_189, %c0_190] : memref<1x1x128xf32, #tpu.memory_space<vmem>>, vector<1x1x128xf32>
    %274 = vector.shape_cast %273 : vector<1x1x128xf32> to vector<1x128xf32>
    %275 = vector.broadcast %274 : vector<1x128xf32> to vector<8x128xf32>
    %276 = arith.addf %272, %275 : vector<8x128xf32>
    %c0_191 = arith.constant 0 : index
    %c0_192 = arith.constant 0 : index
    %277 = vector.load %arg5[%c0_191, %c0_192] : memref<8x128xf32, #tpu.memory_space<vmem>>, vector<8x128xf32>
    tpu.vector_store %arg5[%c0_191, %c0_192], %276 {strides = array<i32>} : memref<8x128xf32, #tpu.memory_space<vmem>>, vector<8x128xf32>,
    return
  }
  func.func @transform_0(%arg0: i32, %arg1: memref<72xi32, #tpu.memory_space<smem>>) -> (i32, i32, i32) {
    %c0_i32 = arith.constant 0 : i32
    %c0_i32_0 = arith.constant 0 : i32
    %c0_i32_1 = arith.constant 0 : i32
    %c0_i32_2 = arith.constant 0 : i32
    return %c0_i32, %c0_i32_0, %c0_i32_1 : i32, i32, i32
  }
  func.func @transform_1(%arg0: i32, %arg1: memref<72xi32, #tpu.memory_space<smem>>) -> (i32, i32, i32) {
    %c0_i32 = arith.constant 0 : i32
    %c0_i32_0 = arith.constant 0 : i32
    %c0_i32_1 = arith.constant 0 : i32
    return %arg0, %c0_i32, %c0_i32_0 : i32, i32, i32
  }
  func.func @transform_2(%arg0: i32, %arg1: memref<72xi32, #tpu.memory_space<smem>>) -> (i32, i32, i32) {
    %c0_i32 = arith.constant 0 : i32
    %c0_i32_0 = arith.constant 0 : i32
    %c0_i32_1 = arith.constant 0 : i32
    return %arg0, %c0_i32, %c0_i32_0 : i32, i32, i32
  }
  func.func @transform_3(%arg0: i32, %arg1: memref<72xi32, #tpu.memory_space<smem>>) -> (i32, i32) {
    %c0_i32 = arith.constant 0 : i32
    %c0_i32_0 = arith.constant 0 : i32
    return %c0_i32, %arg0 : i32, i32
  }
}

</mosaic_0001>

<bundles_post_ra>
// kernel: tpu_custom_call.1
= control target key start
LH: loop header
LB: loop body
LE: loop exit
PB: predicated region body
PF: predicated region fallthrough
CT: control target
= control target key end

     0   :  { %s3754_s0 = inlined_call_operand.vmem [shape: s32[72], index: 0, kind: input, shape index: {}]   ;;  %s3755_s1 = inlined_call_operand.vmem [shape: f32[8,8,32], index: 1, kind: input, shape index: {}]   ;;  %s3756_s2 = inlined_call_operand.vmem [shape: f32[24,96,16], index: 2, kind: input, shape index: {}]   ;;  %s3757_s3 = inlined_call_operand.vmem [shape: f32[3,1,128], index: 3, kind: input, shape index: {}]   ;;  %s3758_s4 = inlined_call_operand.hbm [shape: f32[8,384], index: 4, kind: output, shape index: {}]  }
   0x1   :  { %s9_s17 = sshll.u32 %s3754_s0, 4  ;;  %s10_s17 = int_to_ptr.vmem [resolvable:$true] %s9_s17 }
   0x2   :  { %s3123_s18 = scalar_lea.vmem %s10_s17, 16  ;;  %p3128_p1 = scmp.lt.s32.totalorder %s10_s17, %s10_s17 }
   0x3   :  { %p3124_p0 = scmp.ne.s32.totalorder %s10_s17, %s3123_s18  ;;  %p3129_p2 = scmp.lt.s32.totalorder %s3123_s18, %s3123_s18 }
   0x5   :  { %p3130_p3 = por %p3129_p2, %p3128_p1 }
   0x7   :  { %p3131_p4 = pnand %p3130_p3, %p3124_p0 }
   0x9   :  { %3134 = shalt.err (!%p3131_p4)  }
   0xa   :  { %s3201_s19 = smov [#allocation3]  }
   0xb   :  { %12 = dma.vmem_to_smem %s10_s17, 16, %s3201_s19, [#allocation2] }
   0xc   :  { %3179 = dma.done.wait [#allocation2], 16 }
   0xd   :  { %3180 = vsyncadd [#allocation2], 4294967280 }
   0xe   :  { %14 = sfence }
   0xf   :  { %15 = vsyncpa [#allocation5], 0 }
  0x10   :  { %17 = vsyncpa [#allocation5 + $0x1], 0  ;;  %s3241_s20 = smov 0   ;;  %s3243_s21 = smov 0  }
  0x11   :  { %s3245_s0 = smov 0   ;;  %s3247_s22 = smov 0  }
  0x12 LB: > { %s3262_s23 = sadd.s32 4294967295, %s3199_s22   ;;  %s2367_s24 = sadd.s32 4294967294, %s3199_s22   ;;  %s3199_s22 = sphi %s3247_s22, %s3764_s22   ;;  %s3195_s0 = sphi %s3245_s0, %s3763_s0   ;;  %s3191_s21 = sphi %s3243_s21, %s3762_s21   ;;  %s3187_s20 = sphi %s3241_s20, %s3761_s20  }
  0x13   : > { %s3266_s25 = sadd.s32 1, %s3199_s22   ;;  %s103_s26 = sadd.s32 1, %s3195_s0 }
  0x14   : > { %s100_s27 = ssub.s32 %s3199_s22, %s3266_s25  ;;  %p113_p5 = scmp.ne.s32.totalorder %s3195_s0, %s3191_s21 }
  0x15   : > { %p101_p6 = scmp.eq.s32.totalorder %s100_s27, 0  ;;  %p114_p7 = scmp.eq.s32.totalorder %s3262_s23, 2 }
  0x16   : > { %p119_p8 = scmp.ne.s32.totalorder %s3191_s21, %s3187_s20  ;;  %p120_p9 = scmp.eq.s32.totalorder %s2367_s24, 2 }
  0x17   : > { %s3277_s28 = scalar_select %p101_p6, %s3195_s0, %s103_s26  }
  0x18   : > { %p3279_p10 = por %p114_p7, %p113_p5  ;;  %p3283_p11 = por %p120_p9, %p119_p8 }
  0x19   : > { %p2370_p12 = scmp.ge.s32.totalorder %s3199_s22, 1  ;;  %p157_p13 = scmp.lt.s32.totalorder %s3199_s22, 4 }
  0x1b   : > { %p158_p0 = pnand %p2370_p12, %p157_p13 }
  0x1c   : > { %s3290_s5 = sshll.u32 (!%p158_p0), %s3262_s23, 3  ;;  %s3293_s6 = smul.u32 (!%p158_p0), 24, %s3262_s23  ;;  %v3202_v0 = vmov (!%p158_p0), 0.0|0.0   ;;  %vm3203_vm0 = vmmov (!%p158_p0), 0   ;;  %v3204_v1 = vmov (!%p158_p0), 0.0   ;;  %vm213_vm1 = vcmask (!%p158_p0), 261120  }
  0x1d   : > { %161 = sbr.rel (%p158_p0) target bundleno = 484 (0x1e4), region = 32  ;;  %2896 = vmatprep.subr.bf16.mxu0 (!%p158_p0), %v3202_v0  ;;  %2914 = vmatprep.subr.bf16.mxu1 (!%p158_p0), %v3202_v0  ;;  %p186_p1 = scmp.lt.s32.totalorder (!%p158_p0), %s3290_s5, 23  ;;  %vm2215_vm2 = vcmask (!%p158_p0), 130048   ;;  %vm2218_vm3 = vcmask (!%p158_p0), 392192   ;;  %vm2220_vm4 = vcmask (!%p158_p0), 523264   ;;  %vm2222_vm5 = vcmask (!%p158_p0), 654336  }
  0x1e   : > { %s444_s7 = sadd.s32 (!%p158_p0), 1, %s3290_s5  ;;  %2640 = vmatprep.mubr.msk.f32.mxu0 (!%p158_p0), %vm3203_vm0, %v3204_v1  ;;  %2673 = vmatprep.mubr.msk.f32.mxu1 (!%p158_p0), %vm3203_vm0, %v3204_v1  ;;  %s204_s8 = sadd.s32 (!%p158_p0), 1, %s3293_s6  ;;  %vm2224_vm6 = vcmask (!%p158_p0), 785408   ;;  %vm2226_vm7 = vcmask (!%p158_p0), 916480  }
  0x1f   : > { %s3304_s9 = smul.u32 (!%p158_p0), 3, %s444_s7  ;;  %s205_s11 = sld [smem:[#allocation3 + %s204_s8]] (!%p158_p0) }
  0x20   : > { %s3320_s18 = sld [smem:[#allocation3 + %s3293_s6]] (!%p158_p0)  ;;  %p192_p2 = scmp.lt.s32.totalorder (!%p158_p0), %s3262_s23, 2 }
  0x21   : > { %s455_s12 = sadd.s32 (!%p158_p0), 1, %s3304_s9  ;;  %s3325_s24 = sld [smem:[#allocation3 + %s3304_s9]] (!%p158_p0) }
  0x22   : > { %s456_s14 = sld [smem:[#allocation3 + %s455_s12]] (!%p158_p0) }
  0x24   : > { %s187_s10 = scalar_select %p186_p1, %s3290_s5, 23 }
  0x25   : > { %s2375_s19 = sshll.u32 %s205_s11, 3 }
  0x26   : > { %s3072_s13 = smul.u32 96, %s187_s10  ;;  %s207_s8 = scalar_lea.vmem %s3755_s1, %s2375_s19 }
  0x27   : > { %s360_s10 = sadd.s32 2, %s3293_s6  ;;  %v208_v18 = vld [vmem:[%s207_s8] sm:$0xff]  ;;  %s693_s6 = sadd.s32 2, %s3290_s5 }
  0x28   : > { %s3311_s17 = scalar_lea.vmem %s3756_s2, %s3072_s13  ;;  %s2386_s26 = sshll.u32 %s456_s14, 3 }
  0x29   : > { %v209_v2 = vld [vmem:[%s3311_s17 + $0x20] sm:$0xff]  ;;  %v210_v3 = vld [vmem:[%s3311_s17 + $0x28] sm:$0xff]  ;;  %v211_v7 = vld [vmem:[%s3311_s17 + $0x30] sm:$0xff]  ;;  %s458_s13 = scalar_lea.vmem %s3755_s1, %s2386_s26  ;;  %s610_s14 = sadd.s32 2, %s3304_s9 }
  0x2a   : > { %v2387_v4 = vld [vmem:[%s3311_s17 + $0x80] sm:$0xff]  ;;  %v2897_v5 = vpack.c.bf16 %v210_v3, %v209_v2  ;;  %v2388_v6 = vld [vmem:[%s3311_s17 + $0x88] sm:$0xff]  ;;  %v212_v8 = vld [vmem:[%s3311_s17 + $0x38] sm:$0xff]  ;;  %s3345_s15 = sld [smem:[#allocation3 + %s360_s10]]  ;;  %s2374_s9 = sshll.u32 %s3320_s18, 3 }
  0x2b   : > { %v2915_v9 = vpack.c.bf16 %v2388_v6, %v2387_v4  ;;  %v2389_v10 = vld [vmem:[%s3311_s17 + $0x90] sm:$0xff]  ;;  %v2390_v11 = vld [vmem:[%s3311_s17 + $0x98] sm:$0xff]  ;;  %v2900_v12 = vpack.c.bf16 %v212_v8, %v211_v7  ;;  %v200_v14 = vld [vmem:[%s3311_s17] sm:$0xff]  ;;  %s3347_s16 = sld [smem:[#allocation3 + %s610_s14]]  ;;  %s942_s19 = sadd.s32 3, %s3290_s5 }
  0x2c   : > { %2898 = vmatpush3.bf16.msra.mxu0 %v2897_v5  ;;  %v2918_v13 = vpack.c.bf16 %v2390_v11, %v2389_v10  ;;  %v201_v15 = vld [vmem:[%s3311_s17 + $0x8] sm:$0xff]  ;;  %v2382_v16 = vld [vmem:[%s3311_s17 + $0x60] sm:$0xff]  ;;  %v202_v22 = vld [vmem:[%s3311_s17 + $0x10] sm:$0xff]  ;;  %s2381_s26 = sshll.u32 %s3325_s24, 3  ;;  %s3356_s27 = smul.u32 3, %s693_s6 }
  0x2d   : > { %2916 = vmatpush3.bf16.msra.mxu1 %v2915_v9  ;;  %2899 = vmatprep.subr.bf16.mxu0 %v3202_v0  ;;  %v2383_v17 = vld [vmem:[%s3311_s17 + $0x68] sm:$0xff]  ;;  %v2903_v19 = vpack.c.bf16 %v201_v15, %v200_v14  ;;  %v459_v20 = vld [vmem:[%s458_s13] sm:$0xff]  ;;  %v203_v23 = vld [vmem:[%s3311_s17 + $0x18] sm:$0xff]  ;;  %s3359_s7 = smul.u32 3, %s942_s19  ;;  %s198_s10 = scalar_lea.vmem %s3755_s1, %s2374_s9 }
  0x2e   : > { %2917 = vmatprep.subr.bf16.mxu1 %v3202_v0  ;;  %v2921_v21 = vpack.c.bf16 %v2383_v17, %v2382_v16  ;;  %v2384_v24 = vld [vmem:[%s3311_s17 + $0x70] sm:$0xff]  ;;  %v2385_v25 = vld [vmem:[%s3311_s17 + $0x78] sm:$0xff]  ;;  %v2906_v26 = vpack.c.bf16 %v203_v23, %v202_v22  ;;  %v365_v28 = vld [vmem:[%s3311_s17 + $0x40] sm:$0xff]  ;;  %s448_s12 = scalar_lea.vmem %s3755_s1, %s2381_s26  ;;  %s704_s13 = sadd.s32 1, %s3356_s27 }
  0x2f   : > { %v2924_v27 = vpack.c.bf16 %v2385_v25, %v2384_v24  ;;  %v366_v29 = vld [vmem:[%s3311_s17 + $0x48] sm:$0xff]  ;;  %v2394_v30 = vld [vmem:[%s3311_s17 + $0xa0] sm:$0xff]  ;;  %s953_s14 = sadd.s32 1, %s3359_s7  ;;  %v367_v36 = vld [vmem:[%s3311_s17 + $0x50] sm:$0xff]  ;;  %s3386_s9 = sld [smem:[#allocation3 + %s704_s13]] }
  0x30   : > { %2901 = vmatpush3.bf16.msra.mxu0 %v2900_v12  ;;  %v2395_v31 = vld [vmem:[%s3311_s17 + $0xa8] sm:$0xff]  ;;  %v199_v32 = vld [vmem:[%s198_s10] sm:$0xff]  ;;  %v2909_v33 = vpack.c.bf16 %v366_v29, %v365_v28  ;;  %v368_v37 = vld [vmem:[%s3311_s17 + $0x58] sm:$0xff]  ;;  %s2378_s6 = sshll.u32 %s3345_s15, 3  ;;  %s3390_s26 = sld [smem:[#allocation3 + %s953_s14]] }
  0x31   : > { %2919 = vmatpush3.bf16.msra.mxu1 %v2918_v13  ;;  %2902 = vmatprep.subr.bf16.mxu0 %v3202_v0  ;;  %v449_v34 = vld [vmem:[%s448_s12] sm:$0xff]  ;;  %v2927_v35 = vpack.c.bf16 %v2395_v31, %v2394_v30  ;;  %v2396_v38 = vld [vmem:[%s3311_s17 + $0xb0] sm:$0xff]  ;;  %v2397_v39 = vld [vmem:[%s3311_s17 + $0xb8] sm:$0xff]  ;;  %s2393_s19 = sshll.u32 %s3347_s16, 3  ;;  %v2912_v40 = vpack.c.bf16 %v368_v37, %v367_v36  ;;  %s363_s15 = scalar_lea.vmem %s3755_s1, %s2378_s6 }
  0x32   : > { %2920 = vmatprep.subr.bf16.mxu1 %v3202_v0  ;;  %v2930_v41 = vpack.c.bf16 %v2397_v39, %v2396_v38  ;;  %v2405_v42 = vld [vmem:[%s3311_s17 + $0xe0] sm:$0xff]  ;;  %v2406_v43 = vld [vmem:[%s3311_s17 + $0xe8] sm:$0xff]  ;;  %s613_s24 = scalar_lea.vmem %s3755_s1, %s2393_s19  ;;  %v2407_v50 = vld [vmem:[%s3311_s17 + $0xf0] sm:$0xff]  ;;  %s3417_s12 = sld [smem:[#allocation3 + %s3356_s27]] }
  0x33   : > { %2641 = vmatmul.mubr.msk.f32.vlgmr.msra.gmra.mrb[0].mxu0 %vm213_vm1, %v208_v18  ;;  %v2423_v44 = vld [vmem:[%s3311_s17 + $0x140] sm:$0xff]  ;;  %v2424_v45 = vld [vmem:[%s3311_s17 + $0x148] sm:$0xff]  ;;  %v2933_v47 = vpack.c.bf16 %v2406_v43, %v2405_v42  ;;  %v2408_v51 = vld [vmem:[%s3311_s17 + $0xf8] sm:$0xff]  ;;  %s3422_s14 = sld [smem:[#allocation3 + %s3359_s7]]  ;;  %s1191_s16 = sadd.s32 4, %s3290_s5 }
  0x34   : > { %2674 = vmatmul.mubr.msk.f32.vlgmr.msra.gmra.mrb[0].mxu1 %vm213_vm1, %v459_v20  ;;  %2904 = vmatpush3.bf16.msra.mxu0 %v2903_v19  ;;  %v364_v46 = vld [vmem:[%s363_s15] sm:$0xff]  ;;  %v2951_v49 = vpack.c.bf16 %v2424_v45, %v2423_v44  ;;  %v2425_v52 = vld [vmem:[%s3311_s17 + $0x150] sm:$0xff]  ;;  %v2426_v53 = vld [vmem:[%s3311_s17 + $0x158] sm:$0xff]  ;;  %v2936_v54 = vpack.c.bf16 %v2408_v51, %v2407_v50  ;;  %s859_s15 = sadd.s32 2, %s3356_s27  ;;  %s1108_s10 = sadd.s32 2, %s3359_s7 }
  0x35   : > { %2922 = vmatpush3.bf16.msra.mxu1 %v2921_v21  ;;  %2905 = vmatprep.subr.bf16.mxu0 %v3202_v0  ;;  %v614_v48 = vld [vmem:[%s613_s24] sm:$0xff]  ;;  %s2404_s11 = sshll.u32 %s3386_s9, 3  ;;  %v2954_v55 = vpack.c.bf16 %v2426_v53, %v2425_v52  ;;  %v2401_v57 = vld [vmem:[%s3311_s17 + $0xc8] sm:$0xff]  ;;  %v2402_v2 = vld [vmem:[%s3311_s17 + $0xd0] sm:$0xff]  ;;  %s3447_s27 = sld [smem:[#allocation3 + %s859_s15]] }
  0x36   : > { %2923 = vmatprep.subr.bf16.mxu1 %v3202_v0  ;;  %2651 = vmatprep.mubr.msk.f32.mxu0 %vm3203_vm0, %v3204_v1  ;;  %s2422_s13 = sshll.u32 %s3390_s26, 3  ;;  %s707_s19 = scalar_lea.vmem %s3755_s1, %s2404_s11  ;;  %v2400_v56 = vld [vmem:[%s3311_s17 + $0xc0] sm:$0xff]  ;;  %v2419_v59 = vld [vmem:[%s3311_s17 + $0x128] sm:$0xff]  ;;  %v2403_v3 = vld [vmem:[%s3311_s17 + $0xd8] sm:$0xff] }
  0x37   : > { %2684 = vmatprep.mubr.msk.f32.mxu1 %vm3203_vm0, %v3204_v1  ;;  %s956_s8 = scalar_lea.vmem %s3755_s1, %s2422_s13  ;;  %v2418_v58 = vld [vmem:[%s3311_s17 + $0x120] sm:$0xff]  ;;  %v2939_v61 = vpack.c.bf16 %v2401_v57, %v2400_v56  ;;  %s1440_s24 = sadd.s32 5, %s3290_s5  ;;  %v2420_v4 = vld [vmem:[%s3311_s17 + $0x130] sm:$0xff]  ;;  %v2421_v5 = vld [vmem:[%s3311_s17 + $0x138] sm:$0xff]  ;;  %v2942_v6 = vpack.c.bf16 %v2403_v3, %v2402_v2 }
  0x38   : > { %2907 = vmatpush3.bf16.msra.mxu0 %v2906_v26  ;;  %v708_v60 = vld [vmem:[%s707_s19] sm:$0xff]  ;;  %v2957_v63 = vpack.c.bf16 %v2419_v59, %v2418_v58  ;;  %s2399_s11 = sshll.u32 %s3417_s12, 3  ;;  %s3454_s13 = smul.u32 3, %s1191_s16  ;;  %v2960_v7 = vpack.c.bf16 %v2421_v5, %v2420_v4  ;;  %v2413_v9 = vld [vmem:[%s3311_s17 + $0x108] sm:$0xff]  ;;  %v2414_v16 = vld [vmem:[%s3311_s17 + $0x110] sm:$0xff] }
  0x39   : > { %2925 = vmatpush3.bf16.msra.mxu1 %v2924_v27  ;;  %2908 = vmatprep.subr.bf16.mxu0 %v3202_v0  ;;  %v957_v62 = vld [vmem:[%s956_s8] sm:$0xff]  ;;  %s2417_s7 = sshll.u32 %s3422_s14, 3  ;;  %s3458_s6 = sld [smem:[#allocation3 + %s1108_s10]]  ;;  %v2431_v11 = vld [vmem:[%s3311_s17 + $0x168] sm:$0xff]  ;;  %v2415_v17 = vld [vmem:[%s3311_s17 + $0x118] sm:$0xff] }
  0x3a   : > { %2926 = vmatprep.subr.bf16.mxu1 %v3202_v0  ;;  %s3461_s9 = smul.u32 3, %s1440_s24  ;;  %s697_s26 = scalar_lea.vmem %s3755_s1, %s2399_s11  ;;  %v2412_v8 = vld [vmem:[%s3311_s17 + $0x100] sm:$0xff]  ;;  %v2432_v18 = vld [vmem:[%s3311_s17 + $0x170] sm:$0xff]  ;;  %v2433_v19 = vld [vmem:[%s3311_s17 + $0x178] sm:$0xff]  ;;  %v2948_v20 = vpack.c.bf16 %v2415_v17, %v2414_v16 }
  0x3b   : > { %2652 = vmatmul.mubr.msk.f32.vlgmr.msra.gmra.mrb[0].mxu0 %vm213_vm1, %v199_v32  ;;  %s946_s8 = scalar_lea.vmem %s3755_s1, %s2417_s7  ;;  %v2430_v10 = vld [vmem:[%s3311_s17 + $0x160] sm:$0xff]  ;;  %s1202_s15 = sadd.s32 1, %s3454_s13  ;;  %v2945_v13 = vpack.c.bf16 %v2413_v9, %v2412_v8  ;;  %v2966_v21 = vpack.c.bf16 %v2433_v19, %v2432_v18  ;;  %v2442_v23 = vld [vmem:[%s3311_s17 + $0x1a8] sm:$0xff]  ;;  %v2443_v30 = vld [vmem:[%s3311_s17 + $0x1b0] sm:$0xff] }
  0x3c   : > { %2685 = vmatmul.mubr.msk.f32.vlgmr.msra.gmra.mrb[0].mxu1 %vm213_vm1, %v449_v34  ;;  %2910 = vmatpush3.bf16.msra.mxu0 %v2909_v33  ;;  %v698_v12 = vld [vmem:[%s697_s26] sm:$0xff]  ;;  %s1451_s16 = sadd.s32 1, %s3461_s9  ;;  %v2963_v15 = vpack.c.bf16 %v2431_v11, %v2430_v10  ;;  %s2411_s10 = sshll.u32 %s3447_s27, 3  ;;  %v2460_v25 = vld [vmem:[%s3311_s17 + $0x208] sm:$0xff]  ;;  %v2444_v31 = vld [vmem:[%s3311_s17 + $0x1b8] sm:$0xff] }
  0x3d   : > { %2928 = vmatpush3.bf16.msra.mxu1 %v2927_v35  ;;  %2911 = vmatprep.subr.bf16.mxu0 %v3202_v0  ;;  %v947_v14 = vld [vmem:[%s946_s8] sm:$0xff]  ;;  %s3488_s24 = sld [smem:[#allocation3 + %s1202_s15]]  ;;  %s862_s27 = scalar_lea.vmem %s3755_s1, %s2411_s10  ;;  %v2461_v32 = vld [vmem:[%s3311_s17 + $0x210] sm:$0xff]  ;;  %v2462_v33 = vld [vmem:[%s3311_s17 + $0x218] sm:$0xff]  ;;  %v2972_v34 = vpack.c.bf16 %v2444_v31, %v2443_v30 }
  0x3e   : > { %2929 = vmatprep.subr.bf16.mxu1 %v3202_v0  ;;  %2662 = vmatprep.mubr.msk.f32.mxu0 %vm3203_vm0, %v3204_v1  ;;  %s3492_s7 = sld [smem:[#allocation3 + %s1451_s16]]  ;;  %v2441_v22 = vld [vmem:[%s3311_s17 + $0x1a0] sm:$0xff]  ;;  %v2990_v35 = vpack.c.bf16 %v2462_v33, %v2461_v32  ;;  %v2437_v37 = vld [vmem:[%s3311_s17 + $0x188] sm:$0xff]  ;;  %s1689_s26 = sadd.s32 6, %s3290_s5  ;;  %v2438_v44 = vld [vmem:[%s3311_s17 + $0x190] sm:$0xff] }
  0x3f   : > { %2695 = vmatprep.mubr.msk.f32.mxu1 %vm3203_vm0, %v3204_v1  ;;  %s2429_s11 = sshll.u32 %s3458_s6, 3  ;;  %v2459_v24 = vld [vmem:[%s3311_s17 + $0x200] sm:$0xff]  ;;  %v2969_v27 = vpack.c.bf16 %v2442_v23, %v2441_v22  ;;  %s3519_s8 = sld [smem:[#allocation3 + %s3454_s13]]  ;;  %v2455_v39 = vld [vmem:[%s3311_s17 + $0x1e8] sm:$0xff]  ;;  %v2439_v45 = vld [vmem:[%s3311_s17 + $0x198] sm:$0xff] }
  0x40   : > { %2913 = vmatpush3.bf16.msra.mxu0 %v2912_v40  ;;  %s1111_s14 = scalar_lea.vmem %s3755_s1, %s2429_s11  ;;  %v863_v26 = vld [vmem:[%s862_s27] sm:$0xff]  ;;  %v2987_v29 = vpack.c.bf16 %v2460_v25, %v2459_v24  ;;  %s3524_s16 = sld [smem:[#allocation3 + %s3461_s9]]  ;;  %v2449_v51 = vld [vmem:[%s3311_s17 + $0x1c8] sm:$0xff]  ;;  %v2450_v58 = vld [vmem:[%s3311_s17 + $0x1d0] sm:$0xff] }
  0x41   : > { %2931 = vmatpush3.bf16.msra.mxu1 %v2930_v41  ;;  %2932 = vmatprep.subr.bf16.mxu0 %v3202_v0  ;;  %v1112_v28 = vld [vmem:[%s1111_s14] sm:$0xff]  ;;  %s1357_s27 = sadd.s32 2, %s3454_s13  ;;  %s1606_s6 = sadd.s32 2, %s3461_s9  ;;  %v2467_v53 = vld [vmem:[%s3311_s17 + $0x228] sm:$0xff]  ;;  %v2451_v59 = vld [vmem:[%s3311_s17 + $0x1d8] sm:$0xff] }
  0x42   : > { %2950 = vmatprep.subr.bf16.mxu1 %v3202_v0  ;;  %v2436_v36 = vld [vmem:[%s3311_s17 + $0x180] sm:$0xff]  ;;  %s3549_s13 = sld [smem:[#allocation3 + %s1357_s27]]  ;;  %s1938_s14 = sadd.s32 7, %s3290_s5  ;;  %v2478_v3 = vld [vmem:[%s3311_s17 + $0x268] sm:$0xff]  ;;  %v2479_v10 = vld [vmem:[%s3311_s17 + $0x270] sm:$0xff] }
  0x43   : > { %2663 = vmatmul.mubr.msk.f32.vlgmr.msra.gmra.mrb[0].mxu0 %vm213_vm1, %v364_v46  ;;  %s2440_s18 = sshll.u32 %s3488_s24, 3  ;;  %v2454_v38 = vld [vmem:[%s3311_s17 + $0x1e0] sm:$0xff]  ;;  %v2975_v41 = vpack.c.bf16 %v2437_v37, %v2436_v36  ;;  %v2456_v46 = vld [vmem:[%s3311_s17 + $0x1f0] sm:$0xff]  ;;  %s3560_s10 = smul.u32 3, %s1689_s26  ;;  %v2496_v5 = vld [vmem:[%s3311_s17 + $0x2c8] sm:$0xff] }
  0x44   : > { %2696 = vmatmul.mubr.msk.f32.vlgmr.msra.gmra.mrb[0].mxu1 %vm213_vm1, %v614_v48  ;;  %2934 = vmatpush3.bf16.msra.mxu0 %v2933_v47  ;;  %s2458_s15 = sshll.u32 %s3492_s7, 3  ;;  %s1205_s11 = scalar_lea.vmem %s3755_s1, %s2440_s18  ;;  %v2993_v43 = vpack.c.bf16 %v2455_v39, %v2454_v38  ;;  %v2457_v47 = vld [vmem:[%s3311_s17 + $0x1f8] sm:$0xff]  ;;  %v2978_v48 = vpack.c.bf16 %v2439_v45, %v2438_v44  ;;  %v2448_v50 = vld [vmem:[%s3311_s17 + $0x1c0] sm:$0xff]  ;;  %v2473_v17 = vld [vmem:[%s3311_s17 + $0x248] sm:$0xff] }
  0x45   : > { %2952 = vmatpush3.bf16.msra.mxu1 %v2951_v49  ;;  %2935 = vmatprep.subr.bf16.mxu0 %v3202_v0  ;;  %s1454_s19 = scalar_lea.vmem %s3755_s1, %s2458_s15  ;;  %v1206_v40 = vld [vmem:[%s1205_s11] sm:$0xff]  ;;  %s2435_s9 = sshll.u32 %s3519_s8, 3  ;;  %v2996_v49 = vpack.c.bf16 %v2457_v47, %v2456_v46  ;;  %v2480_v11 = vld [vmem:[%s3311_s17 + $0x278] sm:$0xff]  ;;  %v2491_v19 = vld [vmem:[%s3311_s17 + $0x2a8] sm:$0xff] }
  0x46   : > { %2953 = vmatprep.subr.bf16.mxu1 %v3202_v0  ;;  %2706 = vmatprep.mubr.msk.f32.mxu0 %vm3203_vm0, %v3204_v1  ;;  %v1455_v42 = vld [vmem:[%s1454_s19] sm:$0xff]  ;;  %s3556_s18 = sld [smem:[#allocation3 + %s1606_s6]]  ;;  %s2453_s15 = sshll.u32 %s3524_s16, 3  ;;  %v2474_v24 = vld [vmem:[%s3311_s17 + $0x250] sm:$0xff]  ;;  %v2475_v25 = vld [vmem:[%s3311_s17 + $0x258] sm:$0xff] }
  0x47   : > { %2739 = vmatprep.mubr.msk.f32.mxu1 %vm3203_vm0, %v3204_v1  ;;  %s3563_s5 = smul.u32 3, %s1938_s14  ;;  %s1195_s11 = scalar_lea.vmem %s3755_s1, %s2435_s9  ;;  %v2466_v52 = vld [vmem:[%s3311_s17 + $0x220] sm:$0xff]  ;;  %v2485_v31 = vld [vmem:[%s3311_s17 + $0x288] sm:$0xff]  ;;  %v2486_v38 = vld [vmem:[%s3311_s17 + $0x290] sm:$0xff] }
  0x48   : > { %2937 = vmatpush3.bf16.msra.mxu0 %v2936_v54  ;;  %s1444_s12 = scalar_lea.vmem %s3755_s1, %s2453_s15  ;;  %s1700_s19 = sadd.s32 1, %s3560_s10  ;;  %v1196_v54 = vld [vmem:[%s1195_s11] sm:$0xff]  ;;  %v2999_v57 = vpack.c.bf16 %v2467_v53, %v2466_v52  ;;  %v2503_v33 = vld [vmem:[%s3311_s17 + $0x2e8] sm:$0xff]  ;;  %v2487_v39 = vld [vmem:[%s3311_s17 + $0x298] sm:$0xff] }
  0x49   : > { %2955 = vmatpush3.bf16.msra.mxu1 %v2954_v55  ;;  %2938 = vmatprep.subr.bf16.mxu0 %v3202_v0  ;;  %v2981_v55 = vpack.c.bf16 %v2449_v51, %v2448_v50  ;;  %s1949_s27 = sadd.s32 1, %s3563_s5  ;;  %v1445_v56 = vld [vmem:[%s1444_s12] sm:$0xff]  ;;  %s2447_s6 = sshll.u32 %s3549_s13, 3 }
  0x4a   : > { %2956 = vmatprep.subr.bf16.mxu1 %v3202_v0  ;;  %s3590_s26 = sld [smem:[#allocation3 + %s1700_s19]]  ;;  %s1360_s13 = scalar_lea.vmem %s3755_s1, %s2447_s6  ;;  %v2477_v2 = vld [vmem:[%s3311_s17 + $0x260] sm:$0xff] }
  0x4b   : > { %2707 = vmatmul.mubr.msk.f32.vlgmr.msra.gmra.mrb[2].mxu0 %vm213_vm1, %v708_v60  ;;  %v2468_v60 = vld [vmem:[%s3311_s17 + $0x230] sm:$0xff]  ;;  %s3594_s9 = sld [smem:[#allocation3 + %s1949_s27]]  ;;  %v2495_v4 = vld [vmem:[%s3311_s17 + $0x2c0] sm:$0xff]  ;;  %s1855_s8 = sadd.s32 2, %s3560_s10 }
  0x4c   : > { %2740 = vmatmul.mubr.msk.f32.vlgmr.msra.gmra.mrb[2].mxu1 %vm213_vm1, %v957_v62  ;;  %2940 = vmatpush3.bf16.msra.mxu0 %v2939_v61  ;;  %v2469_v61 = vld [vmem:[%s3311_s17 + $0x238] sm:$0xff]  ;;  %s2465_s14 = sshll.u32 %s3556_s18, 3  ;;  %v2984_v62 = vpack.c.bf16 %v2451_v59, %v2450_v58  ;;  %v3023_v9 = vpack.c.bf16 %v2496_v5, %v2495_v4  ;;  %s3621_s7 = sld [smem:[#allocation3 + %s3560_s10]]  ;;  %v2472_v16 = vld [vmem:[%s3311_s17 + $0x240] sm:$0xff] }
  0x4d   : > { %2958 = vmatpush3.bf16.msra.mxu1 %v2957_v63  ;;  %2941 = vmatprep.subr.bf16.mxu0 %v3202_v0  ;;  %v3002_v63 = vpack.c.bf16 %v2469_v61, %v2468_v60  ;;  %s1609_s11 = scalar_lea.vmem %s3755_s1, %s2465_s14  ;;  %s3626_s19 = sld [smem:[#allocation3 + %s3563_s5]]  ;;  %v2490_v18 = vld [vmem:[%s3311_s17 + $0x2a0] sm:$0xff] }
  0x4e   : > { %2959 = vmatprep.subr.bf16.mxu1 %v3202_v0  ;;  %2717 = vmatprep.mubr.msk.f32.mxu0 %vm3203_vm0, %v3204_v1  ;;  %v1610_v8 = vld [vmem:[%s1609_s11] sm:$0xff]  ;;  %v3029_v23 = vpack.c.bf16 %v2491_v19, %v2490_v18  ;;  %s3654_s10 = sld [smem:[#allocation3 + %s1855_s8]]  ;;  %s3209_s11 = smov 80  }
  0x4f   : > { %2750 = vmatprep.mubr.msk.f32.mxu1 %vm3203_vm0, %v3204_v1  ;;  %v2484_v30 = vld [vmem:[%s3311_s17 + $0x280] sm:$0xff] }
  0x50   : > { %2943 = vmatpush3.bf16.msra.mxu0 %v2942_v6  ;;  %v1361_v6 = vld [vmem:[%s1360_s13] sm:$0xff]  ;;  %s2476_s16 = sshll.u32 %s3590_s26, 3  ;;  %s2104_s13 = sadd.s32 2, %s3563_s5 }
  0x51   : > { %2961 = vmatpush3.bf16.msra.mxu1 %v2960_v7  ;;  %2944 = vmatprep.subr.bf16.mxu0 %v3202_v0  ;;  %v3005_v7 = vpack.c.bf16 %v2478_v3, %v2477_v2  ;;  %s2494_s12 = sshll.u32 %s3594_s9, 3  ;;  %s1703_s26 = scalar_lea.vmem %s3755_s1, %s2476_s16  ;;  %v2502_v32 = vld [vmem:[%s3311_s17 + $0x2e0] sm:$0xff] }
  0x52   : > { %2962 = vmatprep.subr.bf16.mxu1 %v3202_v0  ;;  %s1952_s15 = scalar_lea.vmem %s3755_s1, %s2494_s12  ;;  %s2471_s18 = sshll.u32 %s3621_s7, 3  ;;  %v3035_v37 = vpack.c.bf16 %v2503_v33, %v2502_v32 }
  0x53   : > { %2718 = vmatmul.mubr.msk.f32.vlgmr.msra.gmra.mrb[2].mxu0 %vm213_vm1, %v698_v12  ;;  %v2497_v12 = vld [vmem:[%s3311_s17 + $0x2d0] sm:$0xff]  ;;  %v1953_v22 = vld [vmem:[%s1952_s15] sm:$0xff]  ;;  %s2489_s5 = sshll.u32 %s3626_s19, 3  ;;  %s3658_s24 = sld [smem:[#allocation3 + %s2104_s13]] }
  0x54   : > { %2751 = vmatmul.mubr.msk.f32.vlgmr.msra.gmra.mrb[2].mxu1 %vm213_vm1, %v947_v14  ;;  %2946 = vmatpush3.bf16.msra.mxu0 %v2945_v13  ;;  %v2498_v13 = vld [vmem:[%s3311_s17 + $0x2d8] sm:$0xff]  ;;  %v3008_v14 = vpack.c.bf16 %v2480_v11, %v2479_v10  ;;  %s1693_s7 = scalar_lea.vmem %s3755_s1, %s2471_s18  ;;  %s1942_s27 = scalar_lea.vmem %s3755_s1, %s2489_s5 }
  0x55   : > { %2964 = vmatpush3.bf16.msra.mxu1 %v2963_v15  ;;  %2947 = vmatprep.subr.bf16.mxu0 %v3202_v0  ;;  %v3026_v15 = vpack.c.bf16 %v2498_v13, %v2497_v12  ;;  %v1943_v36 = vld [vmem:[%s1942_s27] sm:$0xff]  ;;  %s2483_s6 = sshll.u32 %s3654_s10, 3  ;;  %s3205_s18 = smov 16  }
  0x56   : > { %2965 = vmatprep.subr.bf16.mxu1 %v3202_v0  ;;  %2728 = vmatprep.mubr.msk.f32.mxu0 %vm3203_vm0, %v3204_v1  ;;  %s1858_s15 = scalar_lea.vmem %s3755_s1, %s2483_s6  ;;  %s3206_s10 = smov 32  }
  0x57   : > { %2761 = vmatprep.mubr.msk.f32.mxu1 %vm3203_vm0, %v3204_v1  ;;  %v1859_v44 = vld [vmem:[%s1858_s15] sm:$0xff]  ;;  %s3207_s5 = smov 48   ;;  %s3210_s16 = smov 96  }
  0x58   : > { %2949 = vmatpush3.bf16.msra.mxu0 %v2948_v20  ;;  %v1704_v20 = vld [vmem:[%s1703_s26] sm:$0xff]  ;;  %s182_s12 = sand.u32 1, %s3191_s21   ;;  %s2509_s9 = sshll.u32 %s3262_s23, 7 }
  0x59   : > { %2967 = vmatpush3.bf16.msra.mxu1 %v2966_v21  ;;  %2968 = vmatprep.subr.bf16.mxu0 %v3202_v0  ;;  %v3011_v21 = vpack.c.bf16 %v2473_v17, %v2472_v16  ;;  %s2501_s26 = sshll.u32 %s3658_s24, 3  ;;  %s3208_s24 = smov 64  }
  0x5a   : > { %2986 = vmatprep.subr.bf16.mxu1 %v3202_v0  ;;  %s2107_s13 = scalar_lea.vmem %s3755_s1, %s2501_s26  ;;  %s2371_s27 = sshll.u32 %s182_s12, 3 }
  0x5b   : > { %2729 = vmatmul.mubr.msk.f32.vlgmr.msra.gmra.mrb[2].mxu0 %vm213_vm1, %v863_v26  ;;  %v2492_v26 = vld [vmem:[%s3311_s17 + $0x2b0] sm:$0xff]  ;;  %v2108_v45 = vld [vmem:[%s2107_s13] sm:$0xff]  ;;  %s193_s19 = scalar_select %p192_p2, %s3262_s23, 2 }
  0x5c   : > { %2762 = vmatmul.mubr.msk.f32.vlgmr.msra.gmra.mrb[2].mxu1 %vm213_vm1, %v1112_v28  ;;  %2970 = vmatpush3.bf16.msra.mxu0 %v2969_v27  ;;  %v2493_v27 = vld [vmem:[%s3311_s17 + $0x2b8] sm:$0xff]  ;;  %v3014_v28 = vpack.c.bf16 %v2475_v25, %v2474_v24  ;;  %s184_s15 = scalar_lea.vmem [#allocation4], %s2371_s27  ;;  %s3212_s23 = smov [#allocation4]  }
  0x5d   : > { %2988 = vmatpush3.bf16.msra.mxu1 %v2987_v29  ;;  %2971 = vmatprep.subr.bf16.mxu0 %v3202_v0  ;;  %v3032_v29 = vpack.c.bf16 %v2493_v27, %v2492_v26  ;;  %s194_s14 = scalar_lea.vmem %s3757_s3, %s193_s19 }
  0x5e   : > { %2989 = vmatprep.subr.bf16.mxu1 %v3202_v0  ;;  %2772 = vmatprep.mubr.msk.f32.mxu0 %vm3203_vm0, %v3204_v1 }
  0x5f   : > { %2805 = vmatprep.mubr.msk.f32.mxu1 %vm3203_vm0, %v3204_v1 }
  0x60   : > { %2973 = vmatpush3.bf16.msra.mxu0 %v2972_v34  ;;  %v1694_v34 = vld [vmem:[%s1693_s7] sm:$0xff]  ;;  %s3211_s7 = smov 112  }
  0x61   : > { %2991 = vmatpush3.bf16.msra.mxu1 %v2990_v35  ;;  %2974 = vmatprep.subr.bf16.mxu0 %v3202_v0  ;;  %v3017_v35 = vpack.c.bf16 %v2485_v31, %v2484_v30 }
  0x62   : > { %2992 = vmatprep.subr.bf16.mxu1 %v3202_v0 }
  0x63   : > { %2773 = vmatmul.mubr.msk.f32.vlgmr.msra.gmra.mrb[4].mxu0 %vm213_vm1, %v1206_v40  ;;  %v2504_v40 = vld [vmem:[%s3311_s17 + $0x2f0] sm:$0xff] }
  0x64   : > { %2806 = vmatmul.mubr.msk.f32.vlgmr.msra.gmra.mrb[4].mxu1 %vm213_vm1, %v1455_v42  ;;  %2976 = vmatpush3.bf16.msra.mxu0 %v2975_v41  ;;  %v2505_v41 = vld [vmem:[%s3311_s17 + $0x2f8] sm:$0xff]  ;;  %v3020_v42 = vpack.c.bf16 %v2487_v39, %v2486_v38  ;;  %s2251_s17 = sshll.u32 %s184_s15, 4  ;;  %s3714_s17 = int_to_ptr.vmem [resolvable:$true] %s2251_s17 }
  0x65   : > { %2994 = vmatpush3.bf16.msra.mxu1 %v2993_v43  ;;  %2977 = vmatprep.subr.bf16.mxu0 %v3202_v0  ;;  %v3038_v43 = vpack.c.bf16 %v2505_v41, %v2504_v40 }
  0x66   : > { %2995 = vmatprep.subr.bf16.mxu1 %v3202_v0  ;;  %2783 = vmatprep.mubr.msk.f32.mxu0 %vm3203_vm0, %v3204_v1 }
  0x67   : > { %2816 = vmatprep.mubr.msk.f32.mxu1 %vm3203_vm0, %v3204_v1 }
  0x68   : > { %2979 = vmatpush3.bf16.msra.mxu0 %v2978_v48 }
  0x69   : > { %2997 = vmatpush3.bf16.msra.mxu1 %v2996_v49  ;;  %2980 = vmatprep.subr.bf16.mxu0 %v3202_v0 }
  0x6a   : > { %2998 = vmatprep.subr.bf16.mxu1 %v3202_v0 }
  0x6b   : > { %2784 = vmatmul.mubr.msk.f32.vlgmr.msra.gmra.mrb[4].mxu0 %vm213_vm1, %v1196_v54 }
  0x6c   : > { %2817 = vmatmul.mubr.msk.f32.vlgmr.msra.gmra.mrb[4].mxu1 %vm213_vm1, %v1445_v56  ;;  %2982 = vmatpush3.bf16.msra.mxu0 %v2981_v55 }
  0x6d   : > { %3000 = vmatpush3.bf16.msra.mxu1 %v2999_v57  ;;  %2983 = vmatprep.subr.bf16.mxu0 %v3202_v0 }
  0x6e   : > { %3001 = vmatprep.subr.bf16.mxu1 %v3202_v0  ;;  %2794 = vmatprep.mubr.msk.f32.mxu0 %vm3203_vm0, %v3204_v1 }
  0x6f   : > { %2827 = vmatprep.mubr.msk.f32.mxu1 %vm3203_vm0, %v3204_v1 }
  0x70   : > { %2985 = vmatpush3.bf16.msra.mxu0 %v2984_v62 }
  0x71   : > { %3003 = vmatpush3.bf16.msra.mxu1 %v3002_v63  ;;  %3004 = vmatprep.subr.bf16.mxu0 %v3202_v0 }
  0x72   : > { %3022 = vmatprep.subr.bf16.mxu1 %v3202_v0 }
  0x73   : > { %2795 = vmatmul.mubr.msk.f32.vlgmr.msra.gmra.mrb[4].mxu0 %vm213_vm1, %v1361_v6 }
  0x74   : > { %2828 = vmatmul.mubr.msk.f32.vlgmr.msra.gmra.mrb[4].mxu1 %vm213_vm1, %v1610_v8  ;;  %3006 = vmatpush3.bf16.msra.mxu0 %v3005_v7  ;;  %v2507_v8 = vld [vmem:[%s194_s14] ss:$0 sm:$0xff] }
  0x75   : > { %3024 = vmatpush3.bf16.msra.mxu1 %v3023_v9  ;;  %3007 = vmatprep.subr.bf16.mxu0 %v3202_v0 }
  0x76   : > { %3025 = vmatprep.subr.bf16.mxu1 %v3202_v0  ;;  %2838 = vmatprep.mubr.msk.f32.mxu0 %vm3203_vm0, %v3204_v1 }
  0x77   : > { %2871 = vmatprep.mubr.msk.f32.mxu1 %vm3203_vm0, %v3204_v1 }
  0x78   : > { %3009 = vmatpush3.bf16.msra.mxu0 %v3008_v14 }
  0x79   : > { %3027 = vmatpush3.bf16.msra.mxu1 %v3026_v15  ;;  %3010 = vmatprep.subr.bf16.mxu0 %v3202_v0 }
  0x7a   : > { %3028 = vmatprep.subr.bf16.mxu1 %v3202_v0 }
  0x7b   : > { %2839 = vmatmul.mubr.msk.f32.vlgmr.msra.gmra.mrb[6].mxu0 %vm213_vm1, %v1704_v20 }
  0x7c   : > { %2872 = vmatmul.mubr.msk.f32.vlgmr.msra.gmra.mrb[6].mxu1 %vm213_vm1, %v1953_v22  ;;  %3012 = vmatpush3.bf16.msra.mxu0 %v3011_v21 }
  0x7d   : > { %3030 = vmatpush3.bf16.msra.mxu1 %v3029_v23  ;;  %3013 = vmatprep.subr.bf16.mxu0 %v3202_v0 }
  0x7e   : > { %3031 = vmatprep.subr.bf16.mxu1 %v3202_v0  ;;  %2849 = vmatprep.mubr.msk.f32.mxu0 %vm3203_vm0, %v3204_v1 }
  0x7f   : > { %2882 = vmatprep.mubr.msk.f32.mxu1 %vm3203_vm0, %v3204_v1 }
  0x80   : > { %3015 = vmatpush3.bf16.msra.mxu0 %v3014_v28 }
  0x81   : > { %3033 = vmatpush3.bf16.msra.mxu1 %v3032_v29  ;;  %3016 = vmatprep.subr.bf16.mxu0 %v3202_v0 }
  0x82   : > { %3034 = vmatprep.subr.bf16.mxu1 %v3202_v0 }
  0x83   : > { %2850 = vmatmul.mubr.msk.f32.vlgmr.msra.gmra.mrb[6].mxu0 %vm213_vm1, %v1694_v34 }
  0x84   : > { %2883 = vmatmul.mubr.msk.f32.vlgmr.msra.gmra.mrb[6].mxu1 %vm213_vm1, %v1943_v36  ;;  %3018 = vmatpush3.bf16.msra.mxu0 %v3017_v35 }
  0x85   : > { %3036 = vmatpush3.bf16.msra.mxu1 %v3035_v37  ;;  %3019 = vmatprep.subr.bf16.mxu0 %v3202_v0 }
  0x86   : > { %3037 = vmatprep.subr.bf16.mxu1 %v3202_v0  ;;  %2860 = vmatprep.mubr.msk.f32.mxu0 %vm3203_vm0, %v3204_v1 }
  0x87   : > { %2893 = vmatprep.mubr.msk.f32.mxu1 %vm3203_vm0, %v3204_v1 }
  0x88   : > { %3021 = vmatpush3.bf16.msra.mxu0 %v3020_v42 }
  0x89   : > { %3039 = vmatpush3.bf16.msra.mxu1 %v3038_v43 }
  0x8b   : > { %2861 = vmatmul.mubr.msk.f32.vlgmr.msra.gmra.mrb[6].mxu0 %vm213_vm1, %v1859_v44 }
  0x8c   : > { %2894 = vmatmul.mubr.msk.f32.vlgmr.msra.gmra.mrb[6].mxu1 %vm213_vm1, %v2108_v45 }
 0x116   : > { %v438_v46 = vpop.f32.mrb[0].mxu0 }
 0x117   : > { %v688_v0 = vpop.f32.mrb[0].mxu1  ;;  %v2664_v47 = vpop.f32.mrb[1].mxu0 }
 0x118   : > { %2188 = vrot.lane.b32.xlu0 %v688_v0, %s3205_s18  ;;  %v2697_v48 = vpop.f32.mrb[1].mxu1  ;;  %s3712_s18 = scalar_lea.hbm %s3758_s4, %s2509_s9 }
 0x12e   : > { %v937_v49 = vpop.f32.mrb[2].mxu0 }
 0x12f   : > { %v1186_v50 = vpop.f32.mrb[2].mxu1  ;;  %2192 = vrot.lane.b32.xlu0 %v937_v49, %s3206_s10  ;;  %v2730_v51 = vpop.f32.mrb[3].mxu0  ;;  %s2238_s10 = scalar_lea.sflag [#allocation5], %s182_s12 }
 0x130   : > { %2196 = vrot.lane.b32.xlu1 %v1186_v50, %s3207_s5  ;;  %v2763_v1 = vpop.f32.mrb[3].mxu1  ;;  %s3135_s5 = scalar_lea.vmem %s3714_s17, 128 }
 0x131   : > { %p3136_p3 = scmp.ne.s32.totalorder %s3714_s17, %s3135_s5 }
 0x133   : > { %p3137_p4 = pnand %p3136_p3, %p3279_p10 }
 0x135   : > { %p3138_p5 = pneg %p3137_p4 }
 0x146   : > { %v1435_v52 = vpop.f32.mrb[4].mxu0 }
 0x147   : > { %v1684_v53 = vpop.f32.mrb[4].mxu1  ;;  %2200 = vrot.lane.b32.xlu1 %v1435_v52, %s3208_s24  ;;  %v2796_v54 = vpop.f32.mrb[5].mxu0  ;;  %s3139_s24 = sshll.u32 %s3212_s23, 4  ;;  %s3140_s24 = int_to_ptr.vmem [resolvable:$false] %s3139_s24 }
 0x148   : > { %v2829_v55 = vpop.f32.mrb[5].mxu1  ;;  %2204 = vrot.lane.b32.xlu0 %v1684_v53, %s3209_s11  ;;  %s3141_s11 = scalar_lea.vmem %s3140_s24, 256  ;;  %p3142_p6 = scmp.lt.s32.totalorder %s3714_s17, %s3140_s24 }
 0x149   : > { %p3143_p7 = scmp.lt.s32.totalorder %s3141_s11, %s3135_s5 }
 0x14b   : > { %p3144_p8 = por %p3143_p7, %p3142_p6 }
 0x14d   : > { %p3145_p9 = pnand %p3144_p8, %p3138_p5 }
 0x15e   : > { %v1933_v56 = vpop.f32.mrb[6].mxu0 }
 0x15f   : > { %v2182_v57 = vpop.f32.mrb[6].mxu1  ;;  %2208 = vrot.lane.b32.xlu1 %v1933_v56, %s3210_s16  ;;  %v2862_v58 = vpop.f32.mrb[7].mxu0 }
 0x160   : > { %v2895_v59 = vpop.f32.mrb[7].mxu1  ;;  %2212 = vrot.lane.b32.xlu0 %v2182_v57, %s3211_s7 }
 0x18a   : > { %v2189_v60 = vpop.permute.xlu0 %2188 }
 0x18b   : > { %v2216_v63 = vsel %vm2215_vm2, %v438_v46, %v2189_v60 }
 0x1a1   : > { %v2193_v62 = vpop.permute.xlu0 %2192 }
 0x1a2   : > { %v2197_v61 = vpop.permute.xlu1 %2196  ;;  %v2217_v2 = vsel %vm213_vm1, %v2216_v63, %v2193_v62 }
 0x1a3   : > { %v2219_v4 = vsel %vm2218_vm3, %v2217_v2, %v2197_v61 }
 0x1b9   : > { %v2201_v3 = vpop.permute.xlu1 %2200 }
 0x1ba   : > { %v2205_v5 = vpop.permute.xlu0 %2204  ;;  %v2221_v6 = vsel %vm2220_vm4, %v2219_v4, %v2201_v3 }
 0x1bb   : > { %v2223_v7 = vsel %vm2222_vm5, %v2221_v6, %v2205_v5 }
 0x1d1   : > { %v2209_v9 = vpop.permute.xlu1 %2208 }
 0x1d2   : > { %v2213_v10 = vpop.permute.xlu0 %2212  ;;  %v2225_v11 = vsel %vm2224_vm6, %v2223_v7, %v2209_v9 }
 0x1d3   : > { %v2227_v12 = vsel %vm2226_vm7, %v2225_v11, %v2213_v10 }
 0x1d4   : > { %v2235_v13 = vadd.f32 %v2507_v8, %v2227_v12 }
 0x1d6   : > { %2236 = vst [vmem:[%s184_s15] sm:$0xff] %v2235_v13 }
 0x1d7   : > { %3148 = shalt.err (!%p3145_p9)
}
 0x1d8   : > { %s3149_s16 = scalar_lea.hbm %s3712_s18, 128  ;;  %s3153_s19 = scalar_lea.hbm %s3758_s4, 384 }
 0x1d9   : > { %p3150_p12 = scmp.ne.s32.totalorder %s3712_s18, %s3149_s16  ;;  %p3154_p1 = scmp.lt.u32.totalorder %s3712_s18, %s3758_s4 }
 0x1da   : > { %p3155_p2 = scmp.lt.u32.totalorder %s3153_s19, %s3149_s16  ;;  %p3157_p4 = scmp.lt.u32.totalorder %s3149_s16, %s3712_s18 }
 0x1db   : > { %p3151_p13 = pnand %p3150_p12, %p3279_p10 }
 0x1dc   : > { %p3156_p3 = por %p3155_p2, %p3154_p1 }
 0x1dd   : > { %p3152_p0 = pneg %p3151_p13 }
 0x1de   : > { %p3158_p5 = por %p3157_p4, %p3156_p3 }
 0x1e0   : > { %p3159_p6 = pnand %p3158_p5, %p3152_p0 }
 0x1e2   : > { %3162 = shalt.err (!%p3159_p6)
}
 0x1e3   : > { %3073 = dma.vmem_to_hbm [thread:$0]  (%p3279_p10), %s3714_s17, 128, %s3712_s18, %s2238_s10  }
 0x1e4 PF: > { %p3079_p7 = scmp.ge.s32.totalorder %s3199_s22, 2  ;;  %s2263_s26 = sand.u32 1, %s3187_s20  }
 0x1e5   : > { %s2264_s14 = scalar_lea.sflag [#allocation5], %s2263_s26 }
 0x1e6   : > { %p3076_p8 = pnand %p3079_p7, %p3283_p11 }
 0x1e8   : > { %3182 = dma.done.wait (!%p3076_p8), %s2264_s14, 128  }
 0x1e9   : > { %3184 = vsyncadd (!%p3076_p8), %s2264_s14, 4294967168  ;;  %p20_p9 = scmp.ge.s32.totalorder %s3266_s25, 5   ;;  %s3761_s20 = smov %s3191_s21 }
 0x1ea   : > { %s3762_s21 = smov %s3195_s0  ;;  %s3763_s0 = smov %s3277_s28 }
 0x1eb   : > { %s3764_s22 = smov %s3266_s25  ;;  %22 = sbr.rel (!%p20_p9) target bundleno = 18 (0x12), region = 101 }
 0x1f2   :  { %2269 = vsyncpa [#allocation5], 1 }
 0x1f3   :  { %2271 = vsyncpa [#allocation5 + $0x1], 1 }

</bundles_post_ra>
